<compile_context>
chip_gen: v6e
topology: v6e:2x2x1
jax: 0.10.0
libtpu: 0.0.40
codegen_flags: <defaults>
</compile_context>

<pallas_src>
import math
from functools import partial

import jax
import jax.numpy as jnp
from jax.experimental import pallas as pl
from jax.experimental.pallas import tpu as pltpu

LN_EPS = 1e-5
NEG_INF = -1e9

# indices of the big matmul weights inside the per-layer / head param lists (cast to bf16)
_LAYER_MM_IDX = frozenset((0, 2, 4, 6, 10, 12))   # wq, wk, wv, wo, w1, w2
_HEAD_MM_IDX = frozenset((0, 4))                  # wt, wd


# ----------------------------- generic helpers -------------------------------

def _layer_norm(x, g, b):
    mu = jnp.mean(x, axis=-1, keepdims=True)
    var = jnp.mean((x - mu) ** 2, axis=-1, keepdims=True)
    return (x - mu) * jax.lax.rsqrt(var + LN_EPS) * g + b


def _gelu(x):
    # tanh approximation of gelu (EUP-friendly).
    return 0.5 * x * (1.0 + jnp.tanh(0.7978845608028654 * (x + 0.044715 * x * x * x)))


def _tpu_generation():
    try:
        kind = jax.devices()[0].device_kind.lower()
    except Exception:
        return 0
    for g in (7, 6, 5, 4):
        if ("v%d" % g) in kind:
            return g
    return 0


def _tpu_vmem_capacity(gen):
    try:
        cap = int(pltpu.get_tpu_info().vmem_capacity_bytes)
        if cap > 0:
            return cap
    except Exception:
        pass
    return (64 if gen >= 7 else 128) * (1 << 20)


def _layer_vmem_estimate(q_tile, S, E, FFN, H):
    """Rough per-step VMEM footprint of the transformer-layer kernel (bytes)."""
    bf, f32 = 2, 4
    dh_pad = max(E // H, 128)                                   # scratch lanes pad to 128
    weights = 2 * (4 * E * E + 2 * E * FFN) * bf                # double-buffered bf16 weights
    small = 2 * (10 * E + FFN) * f32                            # biases + LN params
    io_blocks = 2 * S * E * bf + 2 * q_tile * E * bf + 2 * (S + q_tile) * f32
    kv_scratch = 2 * H * S * dh_pad * bf                        # kh_s + vh_s
    temps = (H * q_tile * S * (f32 + bf) + q_tile * FFN * f32
             + (4 * q_tile * E + 2 * S * E) * f32)
    return weights + small + io_blocks + kv_scratch + temps


def _pick_q_tile(S, E, FFN, H, budget):
    cands = [t for t in (512, 256, 128, 64, 32, 16, 8) if S % t == 0] or [S]
    for t in cands:
        if _layer_vmem_estimate(t, S, E, FFN, H) <= budget:
            return t
    return cands[-1]


def _decoder_vmem_estimate(B, s_tile, v_tile, E):
    bf, f32 = 2, 4
    return (2 * B * s_tile * E * bf         # h block (double-buffered)
            + 2 * E * v_tile * bf           # decoder weight tile
            + 2 * v_tile * f32              # decoder bias tile
            + 2 * B * s_tile * v_tile * bf  # bf16 output block
            + s_tile * v_tile * f32)        # per-b f32 accumulator temp


def _pick_decoder_tiles(B, S, E, V, budget):
    s_cands = [t for t in (1024, 512, 256, 128, 64, 32, 16, 8) if S % t == 0] or [S]
    v_cands = [t for t in (4096, 2048, 1024, 512, 256, 128) if V % t == 0] or [V]
    best = (s_cands[-1], v_cands[-1])
    best_sz = 0
    for st in s_cands:
        for vt in v_cands:
            if _decoder_vmem_estimate(B, st, vt, E) <= budget and st * vt > best_sz:
                best, best_sz = (st, vt), st * vt
    return best


# ------------------------- transformer layer kernel -------------------------

def transformer_layer_kernel(n_heads, q_tile, exp_dtype,
                             x_full_ref, kmask_ref, qmask_ref,
                             wq, bq, wk, bk, wv, bv, wo, bo,
                             ln1g, ln1b, w1, b1, w2, b2, ln2g, ln2b,
                             out_ref, kh_s, vh_s):
    """One post-LN ('aiayn') AR transformer encoder layer, one (batch, query-tile) block.

    K/V (head-stacked, bf16) are computed once per batch row at i == 0 into VMEM scratch
    and reused across all query tiles of that row.
    """
    i = pl.program_id(1)

    S = x_full_ref.shape[1]
    E = x_full_ref.shape[2]
    H = n_heads
    dh = E // H
    TQ = q_tile
    scale = 1.0 / math.sqrt(dh)

    # --- K/V: once per batch row, cached head-stacked in VMEM scratch ---
    @pl.when(i == 0)
    def _():
        xf = x_full_ref[0]                                                   # (S, E) bf16
        k = jnp.dot(xf, wk[...], preferred_element_type=jnp.float32) + bk[...]
        v = jnp.dot(xf, wv[...], preferred_element_type=jnp.float32) + bv[...]
        for h in range(H):
            kh_s[h] = k[:, h * dh:(h + 1) * dh].astype(jnp.bfloat16)
            vh_s[h] = v[:, h * dh:(h + 1) * dh].astype(jnp.bfloat16)

    # --- query tile sliced from the full-sequence block (no duplicated input DMA) ---
    q_start = pl.multiple_of(i * TQ, TQ)
    xq = x_full_ref[0, pl.ds(q_start, TQ), :]                                # (TQ, E) bf16
    kmask = kmask_ref[0]                                                     # (1, S) f32

    q = (jnp.dot(xq, wq[...], preferred_element_type=jnp.float32) + bq[...]) * scale
    qh = jnp.stack([q[:, h * dh:(h + 1) * dh] for h in range(H)],
                   axis=0).astype(jnp.bfloat16)                              # (H, TQ, dh)

    s = jnp.einsum('hqd,hkd->hqk', qh, kh_s[...],
                   preferred_element_type=jnp.float32)                       # (H, TQ, S)

    # additive mask built in-kernel: causal (global query offset i*TQ) AND key not padding
    qpos = i * TQ + jax.lax.broadcasted_iota(jnp.int32, (TQ, S), 0)
    kpos = jax.lax.broadcasted_iota(jnp.int32, (TQ, S), 1)
    allowed = jnp.logical_and(kpos <= qpos, kmask > 0.5)                     # (TQ, S)
    s = s + jnp.where(allowed, 0.0, NEG_INF)[None, :, :]

    m = jnp.max(s, axis=-1, keepdims=True)
    e = jnp.exp((s - m).astype(exp_dtype)).astype(jnp.float32)               # bf16 EUP on v6e+
    p = e * pl.reciprocal(jnp.sum(e, axis=-1, keepdims=True), approx=True)

    ctx = jnp.einsum('hqk,hkd->hqd', p.astype(jnp.bfloat16), vh_s[...],
                     preferred_element_type=jnp.float32)                     # (H, TQ, dh)
    ctx = jnp.concatenate([ctx[h] for h in range(H)], axis=-1)               # (TQ, E) f32

    attn = jnp.dot(ctx.astype(jnp.bfloat16), wo[...],
                   preferred_element_type=jnp.float32) + bo[...]
    x = _layer_norm(xq.astype(jnp.float32) + attn, ln1g[...], ln1b[...])

    h1 = jnp.maximum(
        jnp.dot(x.astype(jnp.bfloat16), w1[...], preferred_element_type=jnp.float32)
        + b1[...], 0.0)
    ffn = jnp.dot(h1.astype(jnp.bfloat16), w2[...],
                  preferred_element_type=jnp.float32) + b2[...]
    x = _layer_norm(x + ffn, ln2g[...], ln2b[...])

    # zero padded query rows via the (TQ, 1) sublane-shaped mask tile
    out_ref[0] = (x * qmask_ref[0]).astype(out_ref.dtype)


def run_transformer_layer(x, kmask_row, qmask_col, params, n_heads, q_tile,
                          exp_dtype, vmem_limit):
    B, S, E = x.shape
    FFN = params[10].shape[1]
    H = n_heads
    n_q = S // q_tile

    def w_spec(a):
        # TODO(synk): pipeline_mode=pl.Buffered(1) here (constant block index) once
        #             single-buffering in pallas_call is confirmed -> halves weight VMEM.
        return pl.BlockSpec(a.shape, lambda *args, _nd=a.ndim: (0,) * _nd)

    in_specs = [
        pl.BlockSpec((1, S, E), lambda b, i: (b, 0, 0)),        # full x (K/V + query slices)
        pl.BlockSpec((1, 1, S), lambda b, i: (b, 0, 0)),        # lane-dense key padding mask
        pl.BlockSpec((1, q_tile, 1), lambda b, i: (b, i, 0)),   # sublane query padding mask
    ] + [w_spec(p) for p in params]

    w_bytes = sum(int(p.size) * p.dtype.itemsize for p in params)
    flops = int(B * (8 * S * E * E + 4 * S * E * FFN + 4 * S * S * E))
    transcendentals = int(B * H * S * S)
    bytes_accessed = int(2 * B * S * E * 2 + 2 * B * S * 4 + w_bytes)

    return pl.pallas_call(
        partial(transformer_layer_kernel, n_heads, q_tile, exp_dtype),
        out_shape=jax.ShapeDtypeStruct((B, S, E), jnp.bfloat16),
        grid=(B, n_q),
        in_specs=in_specs,
        out_specs=pl.BlockSpec((1, q_tile, E), lambda b, i: (b, i, 0)),
        scratch_shapes=[pltpu.VMEM((H, S, E // H), jnp.bfloat16),   # kh_s
                        pltpu.VMEM((H, S, E // H), jnp.bfloat16)],  # vh_s
        compiler_params=pltpu.CompilerParams(
            dimension_semantics=("parallel", "arbitrary"),
            vmem_limit_bytes=vmem_limit),
        cost_estimate=pl.CostEstimate(flops=flops, transcendentals=transcendentals,
                                      bytes_accessed=bytes_accessed),
    )(x, kmask_row, qmask_col, *params)


# ------------------------------ LM head kernels -------------------------------

def lm_transform_kernel(out_scale, x_ref, wt, bt, lng, lnb, h_ref):
    """dense(E,E) -> gelu -> LayerNorm, once per batch row. output_scaling folded in."""
    x = x_ref[0]                                                            # (S, E) bf16
    h = jnp.dot(x, wt[...], preferred_element_type=jnp.float32) * out_scale + bt[...]
    h = _layer_norm(_gelu(h), lng[...], lnb[...])
    h_ref[0] = h.astype(h_ref.dtype)


def run_lm_transform(x, wt, bt, lng, lnb, output_scaling, vmem_limit):
    B, S, E = x.shape
    in_specs = [
        pl.BlockSpec((1, S, E), lambda b: (b, 0, 0)),
        pl.BlockSpec(wt.shape, lambda b: (0, 0)),
        pl.BlockSpec(bt.shape, lambda b: (0, 0)),
        pl.BlockSpec(lng.shape, lambda b: (0, 0)),
        pl.BlockSpec(lnb.shape, lambda b: (0, 0)),
    ]
    return pl.pallas_call(
        partial(lm_transform_kernel, float(output_scaling)),
        out_shape=jax.ShapeDtypeStruct((B, S, E), jnp.bfloat16),
        grid=(B,),
        in_specs=in_specs,
        out_specs=pl.BlockSpec((1, S, E), lambda b: (b, 0, 0)),
        compiler_params=pltpu.CompilerParams(
            dimension_semantics=("parallel",),
            vmem_limit_bytes=vmem_limit),
        cost_estimate=pl.CostEstimate(flops=int(2 * B * S * E * E),
                                      transcendentals=int(B * S * E),
                                      bytes_accessed=int(4 * B * S * E + 2 * E * E)),
    )(x, wt, bt, lng, lnb)


def lm_decoder_kernel(h_ref, wd, bd, out_ref):
    """Tied-decoder matmul; the whole batch is folded into the block so each (E, v_tile)
    decoder-weight tile is reused across all batch rows. bf16 logits (writeback-bound)."""
    for b in range(h_ref.shape[0]):
        out_ref[b] = (jnp.dot(h_ref[b], wd[...], preferred_element_type=jnp.float32)
                      + bd[...]).astype(out_ref.dtype)


def run_lm_decoder(h, wd, bd, s_tile, v_tile, vmem_limit):
    B, S, E = h.shape
    V = wd.shape[1]
    n_s, n_v = S // s_tile, V // v_tile

    in_specs = [
        pl.BlockSpec((B, s_tile, E), lambda s, j: (0, s, 0)),   # h: constant across vocab axis
        pl.BlockSpec((E, v_tile), lambda s, j: (0, j)),         # tied decoder weight tile
        pl.BlockSpec((1, v_tile), lambda s, j: (0, j)),         # decoder bias tile
    ]
    flops = int(2 * B * S * E * V)
    bytes_accessed = int(B * S * E * 2 + n_s * E * V * 2 + B * S * V * 2 + V * 4)

    return pl.pallas_call(
        lm_decoder_kernel,
        out_shape=jax.ShapeDtypeStruct((B, S, V), jnp.bfloat16),
        grid=(n_s, n_v),
        in_specs=in_specs,
        out_specs=pl.BlockSpec((B, s_tile, v_tile), lambda s, j: (0, s, j)),
        compiler_params=pltpu.CompilerParams(
            dimension_semantics=("parallel", "parallel"),
            vmem_limit_bytes=vmem_limit),
        cost_estimate=pl.CostEstimate(flops=flops, transcendentals=0,
                                      bytes_accessed=bytes_accessed),
    )(h, wd, bd)


# ------------------------------ parameter init --------------------------------

def init_params(key, vocab, emb, ffn, n_layers, n_positions):
    keys = jax.random.split(key, 4 + n_layers)

    # token embedding: N(0, emb^-0.5), null/pad row (index 0) zeroed
    tok = jax.random.normal(keys[0], (vocab, emb), jnp.float32) * (emb ** -0.5)
    tok = tok.at[0].set(0.0)

    # sinusoidal positional embeddings (learn_positional_embeddings=False)
    pos_idx = jnp.arange(n_positions, dtype=jnp.float32)[:, None]
    j = jnp.arange(emb // 2, dtype=jnp.float32)[None, :]
    angles = pos_idx / jnp.power(10000.0, 2.0 * j / emb)
    pos = jnp.zeros((n_positions, emb), jnp.float32)
    pos = pos.at[:, 0::2].set(jnp.sin(angles))
    pos = pos.at[:, 1::2].set(jnp.cos(angles))

    def linear(k, din, dout):
        kw, _ = jax.random.split(k)
        w = jax.random.normal(kw, (din, dout), jnp.float32) * (din ** -0.5)
        b = jnp.zeros((1, dout), jnp.float32)
        return w, b

    layers = []
    for li in range(n_layers):
        lk = jax.random.split(keys[1 + li], 6)
        wq, bq = linear(lk[0], emb, emb)
        wk, bk = linear(lk[1], emb, emb)
        wv, bv = linear(lk[2], emb, emb)
        wo, bo = linear(lk[3], emb, emb)
        w1, b1 = linear(lk[4], emb, ffn)
        w2, b2 = linear(lk[5], ffn, emb)
        ln1g = jnp.ones((1, emb), jnp.float32)
        ln1b = jnp.zeros((1, emb), jnp.float32)
        ln2g = jnp.ones((1, emb), jnp.float32)
        ln2b = jnp.zeros((1, emb), jnp.float32)
        layers.append([wq, bq, wk, bk, wv, bv, wo, bo,
                       ln1g, ln1b, w1, b1, w2, b2, ln2g, ln2b])

    # LM prediction head (decoder weight tied to token embedding, as in from_pretrained)
    wt, bt = linear(keys[1 + n_layers], emb, emb)
    lng = jnp.ones((1, emb), jnp.float32)
    lnb = jnp.zeros((1, emb), jnp.float32)
    wd = tok.T                                # tied decoder weight: (E, V)
    bd = jnp.zeros((1, vocab), jnp.float32)
    head = [wt, bt, lng, lnb, wd, bd]

    return tok, pos, layers, head


# ------------------------------ full forward ----------------------------------

def polyencoder_lm_forward(input_ids, tok_emb, pos_emb, layers, head,
                           n_heads, pad_idx=0, embeddings_scale=True,
                           output_scaling=1.0):
    B, S = input_ids.shape
    V, E = tok_emb.shape
    FFN = layers[0][10].shape[1]

    # generation-aware VMEM limit / tiling / exp dtype
    gen = _tpu_generation()
    vmem_cap = _tpu_vmem_capacity(gen)
    vmem_limit = int(max(32 * (1 << 20), min(vmem_cap - 8 * (1 << 20), 112 * (1 << 20))))
    budget = int(0.75 * vmem_limit)
    exp_dtype = jnp.bfloat16 if gen >= 6 else jnp.float32   # v5e has no bf16 EUP

    # cast matmul weights to bf16 once at the boundary (biases / LN params stay f32)
    layers_c = [[p.astype(jnp.bfloat16) if i in _LAYER_MM_IDX else p
                 for i, p in enumerate(lp)] for lp in layers]
    head_c = [p.astype(jnp.bfloat16) if i in _HEAD_MM_IDX else p
              for i, p in enumerate(head)]

    # ---- glue: embeddings + padding masks (gather, not the hot path) ----
    pmask = (input_ids != pad_idx).astype(jnp.float32)          # (B, S)
    kmask_row = pmask[:, None, :]                               # (B, 1, S) lane-dense
    qmask_col = pmask[:, :, None]                               # (B, S, 1) sublane-shaped

    x = tok_emb[input_ids]                                      # (B, S, E) f32
    if embeddings_scale:
        x = x * math.sqrt(E)
    x = x + pos_emb[:S][None]
    x = x * qmask_col                                           # dropout = identity at inference
    x = x.astype(jnp.bfloat16)

    # ---- Pallas hot path: transformer layers + split LM head ----
    # TODO(synk): flash-style key tiling for very long S (S*H*TQ softmax temporaries) not
    #             implemented; q_tile is capped by the VMEM budget instead.
    q_tile = _pick_q_tile(S, E, FFN, n_heads, budget)
    for lp in layers_c:
        x = run_transformer_layer(x, kmask_row, qmask_col, lp, n_heads, q_tile,
                                  exp_dtype, vmem_limit)

    wt, bt, lng, lnb, wd, bd = head_c
    h = run_lm_transform(x, wt, bt, lng, lnb, output_scaling, vmem_limit)

    # NOTE: production vocab should be padded to a multiple of 128 for lane-dense tiles.
    s_tile, v_tile = _pick_decoder_tiles(B, S, E, V, budget)
    scores = run_lm_decoder(h, wd, bd, s_tile, v_tile, vmem_limit)   # (B, S, V) bf16
    return scores


# ----------------------------------- main --------------------------------------

if __name__ == "__main__":
    # small, module-consistent config
    B, S = 2, 8
    VOCAB, EMB, FFN = 64, 32, 64
    N_HEADS, N_LAYERS, N_POS = 2, 2, 16
    PAD = 0

    key = jax.random.PRNGKey(0)
    k_ids, k_params = jax.random.split(key)

    tok_emb, pos_emb, layers, head = init_params(
        k_params, VOCAB, EMB, FFN, N_LAYERS, N_POS)

    input_ids = jax.random.randint(k_ids, (B, S), 1, VOCAB, dtype=jnp.int32)
    # introduce some padding at the tail of batch element 1
    input_ids = input_ids.at[1, S - 2:].set(PAD)

    scores = polyencoder_lm_forward(
        input_ids, tok_emb, pos_emb, layers, head,
        n_heads=N_HEADS, pad_idx=PAD, output_scaling=1.0)
    scores = jax.block_until_ready(scores)

    assert scores.shape == (B, S, VOCAB), scores.shape
    assert bool(jnp.all(jnp.isfinite(scores.astype(jnp.float32))))
    # TODO(synk): optional labels / one_hot_labels cross-entropy loss branch not kernelized.
    print("KERNEL_OK")
</pallas_src>

<mosaic_0001>
module attributes {stable_mosaic.version = 11 : i64} {
  func.func @transformer_layer_kernel(%arg0: i32, %arg1: i32, %arg2: memref<1x8x32xbf16, #tpu.memory_space<vmem>>, %arg3: memref<1x1x8xf32, #tpu.memory_space<vmem>>, %arg4: memref<1x8x1xf32, #tpu.memory_space<vmem>>, %arg5: memref<32x32xbf16, #tpu.memory_space<vmem>>, %arg6: memref<1x32xf32, #tpu.memory_space<vmem>>, %arg7: memref<32x32xbf16, #tpu.memory_space<vmem>>, %arg8: memref<1x32xf32, #tpu.memory_space<vmem>>, %arg9: memref<32x32xbf16, #tpu.memory_space<vmem>>, %arg10: memref<1x32xf32, #tpu.memory_space<vmem>>, %arg11: memref<32x32xbf16, #tpu.memory_space<vmem>>, %arg12: memref<1x32xf32, #tpu.memory_space<vmem>>, %arg13: memref<1x32xf32, #tpu.memory_space<vmem>>, %arg14: memref<1x32xf32, #tpu.memory_space<vmem>>, %arg15: memref<32x64xbf16, #tpu.memory_space<vmem>>, %arg16: memref<1x64xf32, #tpu.memory_space<vmem>>, %arg17: memref<64x32xbf16, #tpu.memory_space<vmem>>, %arg18: memref<1x32xf32, #tpu.memory_space<vmem>>, %arg19: memref<1x32xf32, #tpu.memory_space<vmem>>, %arg20: memref<1x32xf32, #tpu.memory_space<vmem>>, %arg21: memref<1x8x32xbf16, #tpu.memory_space<vmem>>, %arg22: memref<2x8x16xbf16, #tpu.memory_space<vmem>>, %arg23: memref<2x8x16xbf16, #tpu.memory_space<vmem>>) attributes {dimension_semantics = [#tpu.dimension_semantics<parallel>, #tpu.dimension_semantics<arbitrary>], iteration_bounds = array<i64: 2, 1>, scalar_prefetch = 0 : i64, scratch_operands = 2 : i64, tpu.core_type = #tpu.core_type<tc>, window_params = [{transform_indices = @transform_0, window_bounds = array<i64: 1, 8, 32>}, {transform_indices = @transform_1, window_bounds = array<i64: 1, 1, 8>}, {transform_indices = @transform_2, window_bounds = array<i64: 1, 8, 1>}, {pipeline_mode = #tpu.pipeline_mode<synchronous>, transform_indices = @transform_3, window_bounds = array<i64: 32, 32>}, {pipeline_mode = #tpu.pipeline_mode<synchronous>, transform_indices = @transform_4, window_bounds = array<i64: 1, 32>}, {pipeline_mode = #tpu.pipeline_mode<synchronous>, transform_indices = @transform_5, window_bounds = array<i64: 32, 32>}, {pipeline_mode = #tpu.pipeline_mode<synchronous>, transform_indices = @transform_6, window_bounds = array<i64: 1, 32>}, {pipeline_mode = #tpu.pipeline_mode<synchronous>, transform_indices = @transform_7, window_bounds = array<i64: 32, 32>}, {pipeline_mode = #tpu.pipeline_mode<synchronous>, transform_indices = @transform_8, window_bounds = array<i64: 1, 32>}, {pipeline_mode = #tpu.pipeline_mode<synchronous>, transform_indices = @transform_9, window_bounds = array<i64: 32, 32>}, {pipeline_mode = #tpu.pipeline_mode<synchronous>, transform_indices = @transform_10, window_bounds = array<i64: 1, 32>}, {pipeline_mode = #tpu.pipeline_mode<synchronous>, transform_indices = @transform_11, window_bounds = array<i64: 1, 32>}, {pipeline_mode = #tpu.pipeline_mode<synchronous>, transform_indices = @transform_12, window_bounds = array<i64: 1, 32>}, {pipeline_mode = #tpu.pipeline_mode<synchronous>, transform_indices = @transform_13, window_bounds = array<i64: 32, 64>}, {pipeline_mode = #tpu.pipeline_mode<synchronous>, transform_indices = @transform_14, window_bounds = array<i64: 1, 64>}, {pipeline_mode = #tpu.pipeline_mode<synchronous>, transform_indices = @transform_15, window_bounds = array<i64: 64, 32>}, {pipeline_mode = #tpu.pipeline_mode<synchronous>, transform_indices = @transform_16, window_bounds = array<i64: 1, 32>}, {pipeline_mode = #tpu.pipeline_mode<synchronous>, transform_indices = @transform_17, window_bounds = array<i64: 1, 32>}, {pipeline_mode = #tpu.pipeline_mode<synchronous>, transform_indices = @transform_18, window_bounds = array<i64: 1, 32>}, {transform_indices = @transform_19, window_bounds = array<i64: 1, 8, 32>}]} {
    %c0_i32 = arith.constant 0 : i32
    %0 = arith.cmpi eq, %arg1, %c0_i32 : i32
    %1 = arith.extui %0 : i1 to i32
    %c0_i32_0 = arith.constant 0 : i32
    %2 = arith.cmpi ne, %1, %c0_i32_0 : i32
    scf.if %2 {
      %c0_64 = arith.constant 0 : index
      %c0_65 = arith.constant 0 : index
      %c0_66 = arith.constant 0 : index
      %138 = vector.load %arg2[%c0_64, %c0_65, %c0_66] : memref<1x8x32xbf16, #tpu.memory_space<vmem>>, vector<1x8x32xbf16>
      %139 = vector.shape_cast %138 : vector<1x8x32xbf16> to vector<8x32xbf16>
      %c0_67 = arith.constant 0 : index
      %c0_68 = arith.constant 0 : index
      %140 = vector.load %arg7[%c0_67, %c0_68] : memref<32x32xbf16, #tpu.memory_space<vmem>>, vector<32x32xbf16>
      %cst_69 = arith.constant dense<0.000000e+00> : vector<8x32xf32>
      %141 = tpu.matmul %139, %140, %cst_69 {dimension_numbers = #tpu.dot_dimension_numbers<[1], [0], [0], [1], [0, 0, 1, 1], [], []>} : vector<8x32xbf16>, vector<32x32xbf16>, vector<8x32xf32> -> vector<8x32xf32>
      %c0_70 = arith.constant 0 : index
      %c0_71 = arith.constant 0 : index
      %142 = vector.load %arg8[%c0_70, %c0_71] : memref<1x32xf32, #tpu.memory_space<vmem>>, vector<1x32xf32>
      %143 = vector.broadcast %142 : vector<1x32xf32> to vector<8x32xf32>
      %144 = arith.addf %141, %143 : vector<8x32xf32>
      %c0_72 = arith.constant 0 : index
      %c0_73 = arith.constant 0 : index
      %145 = vector.load %arg9[%c0_72, %c0_73] : memref<32x32xbf16, #tpu.memory_space<vmem>>, vector<32x32xbf16>
      %cst_74 = arith.constant dense<0.000000e+00> : vector<8x32xf32>
      %146 = tpu.matmul %139, %145, %cst_74 {dimension_numbers = #tpu.dot_dimension_numbers<[1], [0], [0], [1], [0, 0, 1, 1], [], []>} : vector<8x32xbf16>, vector<32x32xbf16>, vector<8x32xf32> -> vector<8x32xf32>
      %c0_75 = arith.constant 0 : index
      %c0_76 = arith.constant 0 : index
      %147 = vector.load %arg10[%c0_75, %c0_76] : memref<1x32xf32, #tpu.memory_space<vmem>>, vector<1x32xf32>
      %148 = vector.broadcast %147 : vector<1x32xf32> to vector<8x32xf32>
      %149 = arith.addf %146, %148 : vector<8x32xf32>
      %150 = vector.extract_strided_slice %144 {offsets = [0, 0], sizes = [8, 16], strides = [1, 1]} : vector<8x32xf32> to vector<8x16xf32>
      %151 = arith.truncf %150 : vector<8x16xf32> to vector<8x16xbf16>
      %c0_77 = arith.constant 0 : index
      %c0_78 = arith.constant 0 : index
      %c0_79 = arith.constant 0 : index
      %152 = vector.load %arg22[%c0_77, %c0_78, %c0_79] : memref<2x8x16xbf16, #tpu.memory_space<vmem>>, vector<1x8x16xbf16>
      %153 = vector.shape_cast %152 : vector<1x8x16xbf16> to vector<8x16xbf16>
      %154 = vector.shape_cast %151 : vector<8x16xbf16> to vector<1x8x16xbf16>
      tpu.vector_store %arg22[%c0_77, %c0_78, %c0_79], %154 {strides = array<i32>} : memref<2x8x16xbf16, #tpu.memory_space<vmem>>, vector<1x8x16xbf16>,
      %155 = vector.extract_strided_slice %149 {offsets = [0, 0], sizes = [8, 16], strides = [1, 1]} : vector<8x32xf32> to vector<8x16xf32>
      %156 = arith.truncf %155 : vector<8x16xf32> to vector<8x16xbf16>
      %c0_80 = arith.constant 0 : index
      %c0_81 = arith.constant 0 : index
      %c0_82 = arith.constant 0 : index
      %157 = vector.load %arg23[%c0_80, %c0_81, %c0_82] : memref<2x8x16xbf16, #tpu.memory_space<vmem>>, vector<1x8x16xbf16>
      %158 = vector.shape_cast %157 : vector<1x8x16xbf16> to vector<8x16xbf16>
      %159 = vector.shape_cast %156 : vector<8x16xbf16> to vector<1x8x16xbf16>
      tpu.vector_store %arg23[%c0_80, %c0_81, %c0_82], %159 {strides = array<i32>} : memref<2x8x16xbf16, #tpu.memory_space<vmem>>, vector<1x8x16xbf16>,
      %160 = vector.extract_strided_slice %144 {offsets = [0, 16], sizes = [8, 16], strides = [1, 1]} : vector<8x32xf32> to vector<8x16xf32>
      %161 = arith.truncf %160 : vector<8x16xf32> to vector<8x16xbf16>
      %c1 = arith.constant 1 : index
      %c0_83 = arith.constant 0 : index
      %c0_84 = arith.constant 0 : index
      %162 = vector.load %arg22[%c1, %c0_83, %c0_84] : memref<2x8x16xbf16, #tpu.memory_space<vmem>>, vector<1x8x16xbf16>
      %163 = vector.shape_cast %162 : vector<1x8x16xbf16> to vector<8x16xbf16>
      %164 = vector.shape_cast %161 : vector<8x16xbf16> to vector<1x8x16xbf16>
      tpu.vector_store %arg22[%c1, %c0_83, %c0_84], %164 {strides = array<i32>} : memref<2x8x16xbf16, #tpu.memory_space<vmem>>, vector<1x8x16xbf16>,
      %165 = vector.extract_strided_slice %149 {offsets = [0, 16], sizes = [8, 16], strides = [1, 1]} : vector<8x32xf32> to vector<8x16xf32>
      %166 = arith.truncf %165 : vector<8x16xf32> to vector<8x16xbf16>
      %c1_85 = arith.constant 1 : index
      %c0_86 = arith.constant 0 : index
      %c0_87 = arith.constant 0 : index
      %167 = vector.load %arg23[%c1_85, %c0_86, %c0_87] : memref<2x8x16xbf16, #tpu.memory_space<vmem>>, vector<1x8x16xbf16>
      %168 = vector.shape_cast %167 : vector<1x8x16xbf16> to vector<8x16xbf16>
      %169 = vector.shape_cast %166 : vector<8x16xbf16> to vector<1x8x16xbf16>
      tpu.vector_store %arg23[%c1_85, %c0_86, %c0_87], %169 {strides = array<i32>} : memref<2x8x16xbf16, #tpu.memory_space<vmem>>, vector<1x8x16xbf16>,
    } else {
    }
    %c8_i32 = arith.constant 8 : i32
    %3 = arith.muli %arg1, %c8_i32 : i32
    %4 = tpu.assume_multiple %3, 8 : i32
    %c0 = arith.constant 0 : index
    %5 = arith.index_cast %4 : i32 to index
    %c0_1 = arith.constant 0 : index
    %6 = vector.load %arg2[%c0, %5, %c0_1] : memref<1x8x32xbf16, #tpu.memory_space<vmem>>, vector<1x8x32xbf16>
    %7 = vector.shape_cast %6 : vector<1x8x32xbf16> to vector<8x32xbf16>
    %c0_2 = arith.constant 0 : index
    %c0_3 = arith.constant 0 : index
    %c0_4 = arith.constant 0 : index
    %8 = vector.load %arg3[%c0_2, %c0_3, %c0_4] : memref<1x1x8xf32, #tpu.memory_space<vmem>>, vector<1x1x8xf32>
    %9 = vector.shape_cast %8 : vector<1x1x8xf32> to vector<1x8xf32>
    %c0_5 = arith.constant 0 : index
    %c0_6 = arith.constant 0 : index
    %10 = vector.load %arg5[%c0_5, %c0_6] : memref<32x32xbf16, #tpu.memory_space<vmem>>, vector<32x32xbf16>
    %cst = arith.constant dense<0.000000e+00> : vector<8x32xf32>
    %11 = tpu.matmul %7, %10, %cst {dimension_numbers = #tpu.dot_dimension_numbers<[1], [0], [0], [1], [0, 0, 1, 1], [], []>} : vector<8x32xbf16>, vector<32x32xbf16>, vector<8x32xf32> -> vector<8x32xf32>
    %c0_7 = arith.constant 0 : index
    %c0_8 = arith.constant 0 : index
    %12 = vector.load %arg6[%c0_7, %c0_8] : memref<1x32xf32, #tpu.memory_space<vmem>>, vector<1x32xf32>
    %13 = vector.broadcast %12 : vector<1x32xf32> to vector<8x32xf32>
    %14 = arith.addf %11, %13 : vector<8x32xf32>
    %cst_9 = arith.constant 2.500000e-01 : f32
    %15 = vector.broadcast %cst_9 : f32 to vector<8x32xf32>
    %16 = arith.mulf %14, %15 : vector<8x32xf32>
    %17 = vector.extract_strided_slice %16 {offsets = [0, 0], sizes = [8, 16], strides = [1, 1]} : vector<8x32xf32> to vector<8x16xf32>
    %18 = vector.extract_strided_slice %16 {offsets = [0, 16], sizes = [8, 16], strides = [1, 1]} : vector<8x32xf32> to vector<8x16xf32>
    %19 = vector.shape_cast %17 : vector<8x16xf32> to vector<1x8x16xf32>
    %20 = vector.shape_cast %18 : vector<8x16xf32> to vector<1x8x16xf32>
    %21 = tpu.concatenate %19, %20 in 0 : vector<1x8x16xf32>, vector<1x8x16xf32> -> vector<2x8x16xf32>
    %22 = arith.truncf %21 : vector<2x8x16xf32> to vector<2x8x16xbf16>
    %c0_10 = arith.constant 0 : index
    %c0_11 = arith.constant 0 : index
    %c0_12 = arith.constant 0 : index
    %23 = vector.load %arg22[%c0_10, %c0_11, %c0_12] : memref<2x8x16xbf16, #tpu.memory_space<vmem>>, vector<2x8x16xbf16>
    "tpu.trace_start"() <{level = 10 : i32, message = "hqd,hkd->hqk"}> : () -> ()
    %cst_13 = arith.constant dense<0.000000e+00> : vector<2x8x8xf32>
    %24 = tpu.matmul %22, %23, %cst_13 {dimension_numbers = #tpu.dot_dimension_numbers<[2], [2], [1], [1], [0, 0, 0, 1, 1, 1], [0], [0]>} : vector<2x8x16xbf16>, vector<2x8x16xbf16>, vector<2x8x8xf32> -> vector<2x8x8xf32>
    "tpu.trace_stop"() : () -> ()
    %c8_i32_14 = arith.constant 8 : i32
    %25 = arith.muli %arg1, %c8_i32_14 : i32
    %26 = tpu.iota {dimensions = array<i32: 0>} : vector<8x8xi32>
    %27 = vector.broadcast %25 : i32 to vector<8x8xi32>
    %28 = arith.addi %27, %26 : vector<8x8xi32>
    %29 = tpu.iota {dimensions = array<i32: 1>} : vector<8x8xi32>
    %30 = arith.cmpi sle, %29, %28 : vector<8x8xi32>
    %cst_15 = arith.constant 5.000000e-01 : f32
    %31 = vector.broadcast %cst_15 : f32 to vector<1x8xf32>
    %32 = arith.cmpf ogt, %9, %31 : vector<1x8xf32>
    %33 = vector.broadcast %32 : vector<1x8xi1> to vector<8x8xi1>
    %34 = arith.andi %30, %33 : vector<8x8xi1>
    %cst_16 = arith.constant 0.000000e+00 : f32
    %cst_17 = arith.constant -1.000000e+09 : f32
    %35 = vector.broadcast %cst_16 : f32 to vector<8x8xf32>
    %36 = vector.broadcast %cst_17 : f32 to vector<8x8xf32>
    %37 = arith.select %34, %35, %36 : vector<8x8xi1>, vector<8x8xf32>
    %38 = vector.shape_cast %37 : vector<8x8xf32> to vector<1x8x8xf32>
    %39 = vector.broadcast %38 : vector<1x8x8xf32> to vector<2x8x8xf32>
    %40 = arith.addf %24, %39 : vector<2x8x8xf32>
    %cst_18 = arith.constant dense<0xFF800000> : vector<2x8xf32>
    %41 = vector.multi_reduction <maximumf>, %40, %cst_18 [2] : vector<2x8x8xf32> to vector<2x8xf32>
    %42 = vector.shape_cast %41 : vector<2x8xf32> to vector<2x8x1xf32>
    %43 = vector.broadcast %42 : vector<2x8x1xf32> to vector<2x8x8xf32>
    %44 = arith.subf %40, %43 : vector<2x8x8xf32>
    %45 = math.exp %44 : vector<2x8x8xf32>
    %cst_19 = arith.constant dense<0.000000e+00> : vector<2x8xf32>
    %46 = vector.multi_reduction <add>, %45, %cst_19 [2] : vector<2x8x8xf32> to vector<2x8xf32>
    %47 = vector.shape_cast %46 : vector<2x8xf32> to vector<2x8x1xf32>
    %48 = tpu.reciprocal %47 {approx = true} : vector<2x8x1xf32> -> vector<2x8x1xf32>
    %49 = vector.broadcast %48 : vector<2x8x1xf32> to vector<2x8x8xf32>
    %50 = arith.mulf %45, %49 : vector<2x8x8xf32>
    %51 = arith.truncf %50 : vector<2x8x8xf32> to vector<2x8x8xbf16>
    %c0_20 = arith.constant 0 : index
    %c0_21 = arith.constant 0 : index
    %c0_22 = arith.constant 0 : index
    %52 = vector.load %arg23[%c0_20, %c0_21, %c0_22] : memref<2x8x16xbf16, #tpu.memory_space<vmem>>, vector<2x8x16xbf16>
    "tpu.trace_start"() <{level = 10 : i32, message = "hqk,hkd->hqd"}> : () -> ()
    %cst_23 = arith.constant dense<0.000000e+00> : vector<2x8x16xf32>
    %53 = tpu.matmul %51, %52, %cst_23 {dimension_numbers = #tpu.dot_dimension_numbers<[2], [1], [1], [2], [0, 0, 0, 1, 1, 2], [0], [0]>} : vector<2x8x8xbf16>, vector<2x8x16xbf16>, vector<2x8x16xf32> -> vector<2x8x16xf32>
    "tpu.trace_stop"() : () -> ()
    %54 = vector.extract_strided_slice %53 {offsets = [0, 0, 0], sizes = [1, 8, 16], strides = [1, 1, 1]} : vector<2x8x16xf32> to vector<1x8x16xf32>
    %55 = vector.shape_cast %54 : vector<1x8x16xf32> to vector<8x16xf32>
    %56 = vector.extract_strided_slice %53 {offsets = [1, 0, 0], sizes = [1, 8, 16], strides = [1, 1, 1]} : vector<2x8x16xf32> to vector<1x8x16xf32>
    %57 = vector.shape_cast %56 : vector<1x8x16xf32> to vector<8x16xf32>
    %58 = tpu.concatenate %55, %57 in 1 : vector<8x16xf32>, vector<8x16xf32> -> vector<8x32xf32>
    %59 = arith.truncf %58 : vector<8x32xf32> to vector<8x32xbf16>
    %c0_24 = arith.constant 0 : index
    %c0_25 = arith.constant 0 : index
    %60 = vector.load %arg11[%c0_24, %c0_25] : memref<32x32xbf16, #tpu.memory_space<vmem>>, vector<32x32xbf16>
    %cst_26 = arith.constant dense<0.000000e+00> : vector<8x32xf32>
    %61 = tpu.matmul %59, %60, %cst_26 {dimension_numbers = #tpu.dot_dimension_numbers<[1], [0], [0], [1], [0, 0, 1, 1], [], []>} : vector<8x32xbf16>, vector<32x32xbf16>, vector<8x32xf32> -> vector<8x32xf32>
    %c0_27 = arith.constant 0 : index
    %c0_28 = arith.constant 0 : index
    %62 = vector.load %arg12[%c0_27, %c0_28] : memref<1x32xf32, #tpu.memory_space<vmem>>, vector<1x32xf32>
    %63 = vector.broadcast %62 : vector<1x32xf32> to vector<8x32xf32>
    %64 = arith.addf %61, %63 : vector<8x32xf32>
    %65 = arith.extf %7 : vector<8x32xbf16> to vector<8x32xf32>
    %66 = arith.addf %65, %64 : vector<8x32xf32>
    %c0_29 = arith.constant 0 : index
    %c0_30 = arith.constant 0 : index
    %67 = vector.load %arg13[%c0_29, %c0_30] : memref<1x32xf32, #tpu.memory_space<vmem>>, vector<1x32xf32>
    %c0_31 = arith.constant 0 : index
    %c0_32 = arith.constant 0 : index
    %68 = vector.load %arg14[%c0_31, %c0_32] : memref<1x32xf32, #tpu.memory_space<vmem>>, vector<1x32xf32>
    %cst_33 = arith.constant dense<0.000000e+00> : vector<8xf32>
    %69 = vector.multi_reduction <add>, %66, %cst_33 [1] : vector<8x32xf32> to vector<8xf32>
    %70 = vector.shape_cast %69 : vector<8xf32> to vector<8x1xf32>
    %cst_34 = arith.constant 3.200000e+01 : f32
    %71 = vector.broadcast %cst_34 : f32 to vector<8x1xf32>
    %72 = arith.divf %70, %71 : vector<8x1xf32>
    %73 = vector.broadcast %72 : vector<8x1xf32> to vector<8x32xf32>
    %74 = arith.subf %66, %73 : vector<8x32xf32>
    %75 = arith.mulf %74, %74 : vector<8x32xf32>
    %cst_35 = arith.constant dense<0.000000e+00> : vector<8xf32>
    %76 = vector.multi_reduction <add>, %75, %cst_35 [1] : vector<8x32xf32> to vector<8xf32>
    %77 = vector.shape_cast %76 : vector<8xf32> to vector<8x1xf32>
    %cst_36 = arith.constant 3.200000e+01 : f32
    %78 = vector.broadcast %cst_36 : f32 to vector<8x1xf32>
    %79 = arith.divf %77, %78 : vector<8x1xf32>
    %80 = vector.broadcast %72 : vector<8x1xf32> to vector<8x32xf32>
    %81 = arith.subf %66, %80 : vector<8x32xf32>
    %cst_37 = arith.constant 9.99999974E-6 : f32
    %82 = vector.broadcast %cst_37 : f32 to vector<8x1xf32>
    %83 = arith.addf %79, %82 : vector<8x1xf32>
    %84 = math.rsqrt %83 : vector<8x1xf32>
    %85 = vector.broadcast %84 : vector<8x1xf32> to vector<8x32xf32>
    %86 = arith.mulf %81, %85 : vector<8x32xf32>
    %87 = vector.broadcast %67 : vector<1x32xf32> to vector<8x32xf32>
    %88 = arith.mulf %86, %87 : vector<8x32xf32>
    %89 = vector.broadcast %68 : vector<1x32xf32> to vector<8x32xf32>
    %90 = arith.addf %88, %89 : vector<8x32xf32>
    %91 = arith.truncf %90 : vector<8x32xf32> to vector<8x32xbf16>
    %c0_38 = arith.constant 0 : index
    %c0_39 = arith.constant 0 : index
    %92 = vector.load %arg15[%c0_38, %c0_39] : memref<32x64xbf16, #tpu.memory_space<vmem>>, vector<32x64xbf16>
    %cst_40 = arith.constant dense<0.000000e+00> : vector<8x64xf32>
    %93 = tpu.matmul %91, %92, %cst_40 {dimension_numbers = #tpu.dot_dimension_numbers<[1], [0], [0], [1], [0, 0, 1, 1], [], []>} : vector<8x32xbf16>, vector<32x64xbf16>, vector<8x64xf32> -> vector<8x64xf32>
    %c0_41 = arith.constant 0 : index
    %c0_42 = arith.constant 0 : index
    %94 = vector.load %arg16[%c0_41, %c0_42] : memref<1x64xf32, #tpu.memory_space<vmem>>, vector<1x64xf32>
    %95 = vector.broadcast %94 : vector<1x64xf32> to vector<8x64xf32>
    %96 = arith.addf %93, %95 : vector<8x64xf32>
    %cst_43 = arith.constant 0.000000e+00 : f32
    %97 = vector.broadcast %cst_43 : f32 to vector<8x64xf32>
    %98 = arith.maximumf %96, %97 : vector<8x64xf32>
    %99 = arith.truncf %98 : vector<8x64xf32> to vector<8x64xbf16>
    %c0_44 = arith.constant 0 : index
    %c0_45 = arith.constant 0 : index
    %100 = vector.load %arg17[%c0_44, %c0_45] : memref<64x32xbf16, #tpu.memory_space<vmem>>, vector<64x32xbf16>
    %cst_46 = arith.constant dense<0.000000e+00> : vector<8x32xf32>
    %101 = tpu.matmul %99, %100, %cst_46 {dimension_numbers = #tpu.dot_dimension_numbers<[1], [0], [0], [1], [0, 0, 1, 1], [], []>} : vector<8x64xbf16>, vector<64x32xbf16>, vector<8x32xf32> -> vector<8x32xf32>
    %c0_47 = arith.constant 0 : index
    %c0_48 = arith.constant 0 : index
    %102 = vector.load %arg18[%c0_47, %c0_48] : memref<1x32xf32, #tpu.memory_space<vmem>>, vector<1x32xf32>
    %103 = vector.broadcast %102 : vector<1x32xf32> to vector<8x32xf32>
    %104 = arith.addf %101, %103 : vector<8x32xf32>
    %105 = arith.addf %90, %104 : vector<8x32xf32>
    %c0_49 = arith.constant 0 : index
    %c0_50 = arith.constant 0 : index
    %106 = vector.load %arg19[%c0_49, %c0_50] : memref<1x32xf32, #tpu.memory_space<vmem>>, vector<1x32xf32>
    %c0_51 = arith.constant 0 : index
    %c0_52 = arith.constant 0 : index
    %107 = vector.load %arg20[%c0_51, %c0_52] : memref<1x32xf32, #tpu.memory_space<vmem>>, vector<1x32xf32>
    %cst_53 = arith.constant dense<0.000000e+00> : vector<8xf32>
    %108 = vector.multi_reduction <add>, %105, %cst_53 [1] : vector<8x32xf32> to vector<8xf32>
    %109 = vector.shape_cast %108 : vector<8xf32> to vector<8x1xf32>
    %cst_54 = arith.constant 3.200000e+01 : f32
    %110 = vector.broadcast %cst_54 : f32 to vector<8x1xf32>
    %111 = arith.divf %109, %110 : vector<8x1xf32>
    %112 = vector.broadcast %111 : vector<8x1xf32> to vector<8x32xf32>
    %113 = arith.subf %105, %112 : vector<8x32xf32>
    %114 = arith.mulf %113, %113 : vector<8x32xf32>
    %cst_55 = arith.constant dense<0.000000e+00> : vector<8xf32>
    %115 = vector.multi_reduction <add>, %114, %cst_55 [1] : vector<8x32xf32> to vector<8xf32>
    %116 = vector.shape_cast %115 : vector<8xf32> to vector<8x1xf32>
    %cst_56 = arith.constant 3.200000e+01 : f32
    %117 = vector.broadcast %cst_56 : f32 to vector<8x1xf32>
    %118 = arith.divf %116, %117 : vector<8x1xf32>
    %119 = vector.broadcast %111 : vector<8x1xf32> to vector<8x32xf32>
    %120 = arith.subf %105, %119 : vector<8x32xf32>
    %cst_57 = arith.constant 9.99999974E-6 : f32
    %121 = vector.broadcast %cst_57 : f32 to vector<8x1xf32>
    %122 = arith.addf %118, %121 : vector<8x1xf32>
    %123 = math.rsqrt %122 : vector<8x1xf32>
    %124 = vector.broadcast %123 : vector<8x1xf32> to vector<8x32xf32>
    %125 = arith.mulf %120, %124 : vector<8x32xf32>
    %126 = vector.broadcast %106 : vector<1x32xf32> to vector<8x32xf32>
    %127 = arith.mulf %125, %126 : vector<8x32xf32>
    %128 = vector.broadcast %107 : vector<1x32xf32> to vector<8x32xf32>
    %129 = arith.addf %127, %128 : vector<8x32xf32>
    %c0_58 = arith.constant 0 : index
    %c0_59 = arith.constant 0 : index
    %c0_60 = arith.constant 0 : index
    %130 = vector.load %arg4[%c0_58, %c0_59, %c0_60] : memref<1x8x1xf32, #tpu.memory_space<vmem>>, vector<1x8x1xf32>
    %131 = vector.shape_cast %130 : vector<1x8x1xf32> to vector<8x1xf32>
    %132 = vector.broadcast %131 : vector<8x1xf32> to vector<8x32xf32>
    %133 = arith.mulf %129, %132 : vector<8x32xf32>
    %134 = arith.truncf %133 : vector<8x32xf32> to vector<8x32xbf16>
    %c0_61 = arith.constant 0 : index
    %c0_62 = arith.constant 0 : index
    %c0_63 = arith.constant 0 : index
    %135 = vector.load %arg21[%c0_61, %c0_62, %c0_63] : memref<1x8x32xbf16, #tpu.memory_space<vmem>>, vector<1x8x32xbf16>
    %136 = vector.shape_cast %135 : vector<1x8x32xbf16> to vector<8x32xbf16>
    %137 = vector.shape_cast %134 : vector<8x32xbf16> to vector<1x8x32xbf16>
    tpu.vector_store %arg21[%c0_61, %c0_62, %c0_63], %137 {strides = array<i32>} : memref<1x8x32xbf16, #tpu.memory_space<vmem>>, vector<1x8x32xbf16>,
    return
  }
  func.func @transform_0(%arg0: i32, %arg1: i32) -> (i32, i32, i32) {
    %c0_i32 = arith.constant 0 : i32
    %c0_i32_0 = arith.constant 0 : i32
    %c0_i32_1 = arith.constant 0 : i32
    return %arg0, %c0_i32, %c0_i32_0 : i32, i32, i32
  }
  func.func @transform_1(%arg0: i32, %arg1: i32) -> (i32, i32, i32) {
    %c0_i32 = arith.constant 0 : i32
    %c0_i32_0 = arith.constant 0 : i32
    %c0_i32_1 = arith.constant 0 : i32
    return %arg0, %c0_i32, %c0_i32_0 : i32, i32, i32
  }
  func.func @transform_2(%arg0: i32, %arg1: i32) -> (i32, i32, i32) {
    %c0_i32 = arith.constant 0 : i32
    %c0_i32_0 = arith.constant 0 : i32
    return %arg0, %arg1, %c0_i32 : i32, i32, i32
  }
  func.func @transform_3(%arg0: i32, %arg1: i32) -> (i32, i32) {
    %c0_i32 = arith.constant 0 : i32
    %c0_i32_0 = arith.constant 0 : i32
    %c0_i32_1 = arith.constant 0 : i32
    return %c0_i32, %c0_i32_0 : i32, i32
  }
  func.func @transform_4(%arg0: i32, %arg1: i32) -> (i32, i32) {
    %c0_i32 = arith.constant 0 : i32
    %c0_i32_0 = arith.constant 0 : i32
    %c0_i32_1 = arith.constant 0 : i32
    return %c0_i32, %c0_i32_0 : i32, i32
  }
  func.func @transform_5(%arg0: i32, %arg1: i32) -> (i32, i32) {
    %c0_i32 = arith.constant 0 : i32
    %c0_i32_0 = arith.constant 0 : i32
    %c0_i32_1 = arith.constant 0 : i32
    return %c0_i32, %c0_i32_0 : i32, i32
  }
  func.func @transform_6(%arg0: i32, %arg1: i32) -> (i32, i32) {
    %c0_i32 = arith.constant 0 : i32
    %c0_i32_0 = arith.constant 0 : i32
    %c0_i32_1 = arith.constant 0 : i32
    return %c0_i32, %c0_i32_0 : i32, i32
  }
  func.func @transform_7(%arg0: i32, %arg1: i32) -> (i32, i32) {
    %c0_i32 = arith.constant 0 : i32
    %c0_i32_0 = arith.constant 0 : i32
    %c0_i32_1 = arith.constant 0 : i32
    return %c0_i32, %c0_i32_0 : i32, i32
  }
  func.func @transform_8(%arg0: i32, %arg1: i32) -> (i32, i32) {
    %c0_i32 = arith.constant 0 : i32
    %c0_i32_0 = arith.constant 0 : i32
    %c0_i32_1 = arith.constant 0 : i32
    return %c0_i32, %c0_i32_0 : i32, i32
  }
  func.func @transform_9(%arg0: i32, %arg1: i32) -> (i32, i32) {
    %c0_i32 = arith.constant 0 : i32
    %c0_i32_0 = arith.constant 0 : i32
    %c0_i32_1 = arith.constant 0 : i32
    return %c0_i32, %c0_i32_0 : i32, i32
  }
  func.func @transform_10(%arg0: i32, %arg1: i32) -> (i32, i32) {
    %c0_i32 = arith.constant 0 : i32
    %c0_i32_0 = arith.constant 0 : i32
    %c0_i32_1 = arith.constant 0 : i32
    return %c0_i32, %c0_i32_0 : i32, i32
  }
  func.func @transform_11(%arg0: i32, %arg1: i32) -> (i32, i32) {
    %c0_i32 = arith.constant 0 : i32
    %c0_i32_0 = arith.constant 0 : i32
    %c0_i32_1 = arith.constant 0 : i32
    return %c0_i32, %c0_i32_0 : i32, i32
  }
  func.func @transform_12(%arg0: i32, %arg1: i32) -> (i32, i32) {
    %c0_i32 = arith.constant 0 : i32
    %c0_i32_0 = arith.constant 0 : i32
    %c0_i32_1 = arith.constant 0 : i32
    return %c0_i32, %c0_i32_0 : i32, i32
  }
  func.func @transform_13(%arg0: i32, %arg1: i32) -> (i32, i32) {
    %c0_i32 = arith.constant 0 : i32
    %c0_i32_0 = arith.constant 0 : i32
    %c0_i32_1 = arith.constant 0 : i32
    return %c0_i32, %c0_i32_0 : i32, i32
  }
  func.func @transform_14(%arg0: i32, %arg1: i32) -> (i32, i32) {
    %c0_i32 = arith.constant 0 : i32
    %c0_i32_0 = arith.constant 0 : i32
    %c0_i32_1 = arith.constant 0 : i32
    return %c0_i32, %c0_i32_0 : i32, i32
  }
  func.func @transform_15(%arg0: i32, %arg1: i32) -> (i32, i32) {
    %c0_i32 = arith.constant 0 : i32
    %c0_i32_0 = arith.constant 0 : i32
    %c0_i32_1 = arith.constant 0 : i32
    return %c0_i32, %c0_i32_0 : i32, i32
  }
  func.func @transform_16(%arg0: i32, %arg1: i32) -> (i32, i32) {
    %c0_i32 = arith.constant 0 : i32
    %c0_i32_0 = arith.constant 0 : i32
    %c0_i32_1 = arith.constant 0 : i32
    return %c0_i32, %c0_i32_0 : i32, i32
  }
  func.func @transform_17(%arg0: i32, %arg1: i32) -> (i32, i32) {
    %c0_i32 = arith.constant 0 : i32
    %c0_i32_0 = arith.constant 0 : i32
    %c0_i32_1 = arith.constant 0 : i32
    return %c0_i32, %c0_i32_0 : i32, i32
  }
  func.func @transform_18(%arg0: i32, %arg1: i32) -> (i32, i32) {
    %c0_i32 = arith.constant 0 : i32
    %c0_i32_0 = arith.constant 0 : i32
    %c0_i32_1 = arith.constant 0 : i32
    return %c0_i32, %c0_i32_0 : i32, i32
  }
  func.func @transform_19(%arg0: i32, %arg1: i32) -> (i32, i32, i32) {
    %c0_i32 = arith.constant 0 : i32
    %c0_i32_0 = arith.constant 0 : i32
    return %arg0, %arg1, %c0_i32 : i32, i32, i32
  }
}

</mosaic_0001>

<bundles_post_ra>
// kernel: tpu_custom_call.1
= control target key start
LH: loop header
LB: loop body
LE: loop exit
PB: predicated region body
PF: predicated region fallthrough
CT: control target
= control target key end

     0   :  { %s2653_s0 = inlined_call_operand.hbm [shape: bf16[2,8,32], index: 0, kind: input, shape index: {}]   ;;  %s2654_s1 = inlined_call_operand.hbm [shape: f32[2,1,8], index: 1, kind: input, shape index: {}]   ;;  %s2655_s2 = inlined_call_operand.vmem [shape: f32[2,8,1], index: 2, kind: input, shape index: {}]   ;;  %s2656_s3 = inlined_call_operand.vmem [shape: bf16[32,32], index: 3, kind: input, shape index: {}]   ;;  %s2657_s4 = inlined_call_operand.hbm [shape: f32[1,32], index: 4, kind: input, shape index: {}]   ;;  %s2658_s5 = inlined_call_operand.vmem [shape: bf16[32,32], index: 5, kind: input, shape index: {}]   ;;  %s2659_s6 = inlined_call_operand.hbm [shape: f32[1,32], index: 6, kind: input, shape index: {}]   ;;  %s2660_s7 = inlined_call_operand.vmem [shape: bf16[32,32], index: 7, kind: input, shape index: {}]   ;;  %s2661_s8 = inlined_call_operand.hbm [shape: f32[1,32], index: 8, kind: input, shape index: {}]   ;;  %s2662_s9 = inlined_call_operand.vmem [shape: bf16[32,32], index: 9, kind: input, shape index: {}]   ;;  %s2663_s10 = inlined_call_operand.vmem [shape: f32[1,32], index: 10, kind: input, shape index: {}]   ;;  %s2664_s11 = inlined_call_operand.vmem [shape: f32[1,32], index: 11, kind: input, shape index: {}]   ;;  %s2665_s12 = inlined_call_operand.vmem [shape: f32[1,32], index: 12, kind: input, shape index: {}]   ;;  %s2666_s13 = inlined_call_operand.vmem [shape: bf16[32,64], index: 13, kind: input, shape index: {}]   ;;  %s2667_s14 = inlined_call_operand.vmem [shape: f32[1,64], index: 14, kind: input, shape index: {}]   ;;  %s2668_s15 = inlined_call_operand.vmem [shape: bf16[64,32], index: 15, kind: input, shape index: {}]   ;;  %s2669_s16 = inlined_call_operand.vmem [shape: f32[1,32], index: 16, kind: input, shape index: {}]   ;;  %s2670_s17 = inlined_call_operand.vmem [shape: f32[1,32], index: 17, kind: input, shape index: {}]   ;;  %s2671_s18 = inlined_call_operand.vmem [shape: f32[1,32], index: 18, kind: input, shape index: {}]   ;;  %s2672_s19 = inlined_call_operand.hbm [shape: bf16[2,8,32], index: 19, kind: output, shape index: {}]  }
   0x1   :  { %2686 = sst [smem:[#allocation27_spill]] %s2653_s0 }
   0x2   :  { %2687 = sst [smem:[#allocation28_spill]] %s2654_s1 }
   0x3   :  { %2688 = sst [smem:[#allocation29_spill]] %s2655_s2 }
   0x4   :  { %2689 = sst [smem:[#allocation30_spill]] %s2656_s3 }
   0x5   :  { %2690 = sst [smem:[#allocation31_spill]] %s2657_s4 }
   0x6   :  { %2691 = sst [smem:[#allocation32_spill]] %s2659_s6 }
   0x7   :  { %2692 = sst [smem:[#allocation33_spill]] %s2661_s8 }
   0x8   :  { %2693 = sst [smem:[#allocation34_spill]] %s2667_s14 }
   0x9   :  { %2694 = sst [smem:[#allocation35_spill]] %s2669_s16 }
   0xa   :  { %2695 = sst [smem:[#allocation36_spill]] %s2670_s17 }
   0xb   :  { %2696 = sst [smem:[#allocation37_spill]] %s2671_s18 }
   0xc   :  { %2697 = sst [smem:[#allocation38_spill]] %s2672_s19 }
   0xd   :  { %24 = vsyncpa [#allocation5], 0 }
   0xe   :  { %26 = vsyncpa [#allocation5 + $0x1], 0 }
   0xf   :  { %27 = vsyncpa [#allocation8], 0 }
  0x10   :  { %29 = vsyncpa [#allocation8 + $0x1], 0 }
  0x11   :  { %30 = vsyncpa [#allocation11], 0 }
  0x12   :  { %31 = vsyncpa [#allocation6], 0 }
  0x13   :  { %33 = vsyncpa [#allocation6 + $0x1], 0  ;;  %s2290_s0 = smov 0   ;;  %s2292_s30 = smov 0  }
  0x14   :  { %s2294_s20 = smov 0   ;;  %s2296_s21 = smov 0  }
  0x15   :  { %s2298_s1 = smov 0   ;;  %s2300_s22 = smov 0  }
  0x16 LB: > { %2698 = sst [smem:[#allocation19_spill]] %s2156_s0  ;;  %s2321_s2 = sadd.s32 4294967295, %s2176_s22   ;;  %s2176_s22 = sphi %s2300_s22, %s39_s22   ;;  %s2172_s1 = sphi %s2298_s1, %s2744_s1   ;;  %s2168_s21 = sphi %s2296_s21, %s2743_s21   ;;  %s2164_s20 = sphi %s2294_s20, %s2739_s20   ;;  %s2160_s30 = sphi %s2292_s30, %s2742_s30   ;;  %s2156_s0 = sphi %s2290_s0, %s2741_s0  }
  0x17   : > { %2699 = sst [smem:[#allocation20_spill]] %s2164_s20  ;;  %s1656_s23 = sadd.s32 4294967294, %s2176_s22  }
  0x18   : > { %2700 = sst [smem:[#allocation21_spill]] %s2168_s21  ;;  %p71_p0 = scmp.ne.s32.totalorder %s2160_s30, %s2156_s0 }
  0x19   : > { %2701 = sst [smem:[#allocation22_spill]] %s2176_s22  ;;  %p2677_p1 = scmp.eq.s32.totalorder %s2321_s2, 0 }
  0x1a   : > { %p493_p3 = scmp.eq.s32.totalorder %s1656_s23, 1  ;;  %p1657_p5 = scmp.ge.s32.totalorder %s2176_s22, 1 }
  0x1b   : > { %p2330_p4 = por %p2677_p1, %p71_p0  ;;  %p500_p7 = scmp.lt.s32.totalorder %s2176_s22, 3 }
  0x1c   : > { %p2335_p6 = por %p493_p3, %p71_p0  ;;  %s2178_s26 = smov [#allocation9]  }
  0x1d   : > { %s2702_s24 = scalar_select %p2330_p4, 1, 0 }
  0x1e   : > { %s2703_s25 = scalar_select %p2335_p6, 1, 0 }
  0x1f   : > { %p2340_p8 = pnand %p1657_p5, %p500_p7  ;;  %s516_s27 = sshll.u32 %s2178_s26, 4  ;;  %s517_s27 = int_to_ptr.vmem [resolvable:$true] %s516_s27 }
  0x20   : > { %2704 = sst [smem:[#allocation23_spill]] %s2703_s25  ;;  %s2179_s28 = smov [#allocation10]  }
  0x21   : > { %p1836_p10 = pneg %p2340_p8  ;;  %s530_s29 = sshll.u32 %s2179_s28, 4  ;;  %s531_s29 = int_to_ptr.vmem [resolvable:$true] %s530_s29 }
  0x22   : > { %s2180_s25 = smov [#allocation12]   ;;  %s1961_s26 = scalar_lea.vmem %s517_s27, 16 }
  0x23   : > { %p2349_p11 = pnand %p1836_p10, %p2677_p1  ;;  %s544_s0 = sshll.u32 %s2180_s25, 4  ;;  %s2353_s0 = int_to_ptr.vmem [resolvable:$true] %s544_s0 }
  0x24   : > { %p1962_p13 = scmp.ne.s32.totalorder %s517_s27, %s1961_s26  ;;  %s1968_s28 = scalar_lea.vmem %s517_s27, 32 }
  0x25   : > { %p1952_p12 = pneg %p2349_p11  ;;  %p1969_p5 = scmp.lt.s32.totalorder %s517_s27, %s517_s27 }
  0x26   : > { %p1970_p7 = scmp.lt.s32.totalorder %s1968_s28, %s1961_s26 }
  0x27   : > { %p1964_p0 = pnand %p1962_p13, %p1952_p12 }
  0x28   : > { %p1971_p10 = por %p1970_p7, %p1969_p5 }
  0x29   : > { %p1965_p3 = pneg %p1964_p0 }
  0x2b   : > { %p1972_p9 = pnand %p1971_p10, %p1965_p3 }
  0x2d   : > { %1975 = shalt.err (!%p1972_p9)
}
  0x2e   : > { %s2707_s4 = sld [smem:[#allocation31_spill]]  ;;  %s1987_s18 = scalar_lea.vmem %s531_s29, 16 }
  0x2f   : > { %p1988_p1 = scmp.ne.s32.totalorder %s531_s29, %s1987_s18  ;;  %s1994_s17 = scalar_lea.vmem %s531_s29, 32 }
  0x30   : > { %p1995_p0 = scmp.lt.s32.totalorder %s531_s29, %s531_s29  ;;  %p1996_p6 = scmp.lt.s32.totalorder %s1994_s17, %s1987_s18 }
  0x31   : > { %p1990_p2 = pnand %p1988_p1, %p1952_p12 }
  0x32   : > { %p1997_p4 = por %p1996_p6, %p1995_p0 }
  0x33   : > { %p1991_p13 = pneg %p1990_p2 }
  0x34   : > { %1839 = dma.hbm_to_vmem [thread:$0]  (!%p2349_p11), %s2707_s4, 16, %s517_s27, [#allocation8]  }
  0x35   : > { %p1998_p5 = pnand %p1997_p4, %p1991_p13 }
  0x37   : > { %2001 = shalt.err (!%p1998_p5)
}
  0x38   : > { %s2708_s6 = sld [smem:[#allocation32_spill]]  ;;  %s2013_s19 = scalar_lea.vmem %s2353_s0, 16 }
  0x39   : > { %p2014_p1 = scmp.ne.s32.totalorder %s2353_s0, %s2013_s19  ;;  %s2020_s17 = scalar_lea.vmem %s2353_s0, 32 }
  0x3a   : > { %p2021_p4 = scmp.lt.s32.totalorder %s2353_s0, %s2353_s0  ;;  %p2022_p6 = scmp.lt.s32.totalorder %s2020_s17, %s2013_s19 }
  0x3b   : > { %p2016_p2 = pnand %p2014_p1, %p1952_p12 }
  0x3c   : > { %p2023_p3 = por %p2022_p6, %p2021_p4 }
  0x3d   : > { %p2017_p9 = pneg %p2016_p2 }
  0x3e   : > { %1842 = dma.hbm_to_vmem [thread:$0]  (!%p2349_p11), %s2708_s6, 16, %s531_s29, [#allocation11]  }
  0x3f   : > { %p2024_p7 = pnand %p2023_p3, %p2017_p9 }
  0x41   : > { %2027 = shalt.err (!%p2024_p7)
}
  0x42   : > { %s2709_s8 = sld [smem:[#allocation33_spill]]  ;;  %s58_s29 = sadd.s32 1, %s2164_s20 }
  0x43   : > { %s51_s25 = sadd.s32 1, %s2172_s1  ;;  %p65_p12 = scmp.ne.s32.totalorder %s2164_s20, %s2160_s30 }
  0x44   : > { %p53_p10 = scmp.ge.s32.totalorder %s51_s25, 2  ;;  %p66_p13 = scmp.eq.s32.totalorder %s2176_s22, 0 }
  0x45   : > { %p2710_p0 = scmp.eq.s32.totalorder %s2321_s2, 1  ;;  %p1860_p1 = scmp.lt.s32.totalorder %s2176_s22, 2 }
  0x46   : > { %s2746_s25 = smov (%p53_p10, %s51_s25), 0  ;;  %p67_p2 = por %p66_p13, %p65_p12 }
  0x47   : > { %p2394_p5 = por %p2710_p0, %p65_p12  ;;  %2713 = sst [smem:[#allocation25_spill]] %s2746_s25 }
  0x48   : > { %1845 = dma.hbm_to_vmem [thread:$0]  (!%p2349_p11), %s2709_s8, 16, %s2353_s0, [#allocation11]  }
  0x49   : > { %s2711_s23 = scalar_select %p2394_p5, 1, 0 }
  0x4a   : > { %s2402_s26 = sand.u32 1, %s2164_s20   ;;  %s55_s0 = ssub.s32 %s2172_s1, %s2746_s25 }
  0x4b   : > { %2712 = sst [smem:[#allocation24_spill]] %s2711_s23  ;;  %p56_p11 = scmp.eq.s32.totalorder %s55_s0, 0 }
  0x4c   : > { %s1662_s28 = sshll.u32 %s2402_s26, 2  ;;  %s1663_s19 = sshll.u32 %s2172_s1, 6 }
  0x4d   : > { %s2409_s17 = scalar_select %p56_p11, %s2164_s20, %s58_s29  }
  0x4e   : > { %s2715_s4 = sld [smem:[#allocation27_spill]]  ;;  %s589_s8 = scalar_lea.vmem [#allocation4], %s1662_s28 }
  0x4f   : > { %2714 = sst [smem:[#allocation26_spill]] %s2409_s17  ;;  %s596_s23 = sshll.u32 %s589_s8, 4  ;;  %s597_s23 = int_to_ptr.vmem [resolvable:$true] %s596_s23 }
  0x50   : > { %p2416_p9 = pnand %p1860_p1, %p67_p2  ;;  %s603_s25 = sand.u32 1, %s2176_s22  }
  0x51   : > { %s586_s0 = scalar_lea.sflag [#allocation5], %s2402_s26  ;;  %s2041_s29 = scalar_lea.vmem %s597_s23, 64 }
  0x52   : > { %p2030_p4 = pneg %p2416_p9  ;;  %p2042_p6 = scmp.ne.s32.totalorder %s597_s23, %s2041_s29 }
  0x54   : > { %s594_s6 = scalar_lea.hbm %s2715_s4, %s1663_s19  ;;  %p2044_p3 = pnand %p2042_p6, %p2030_p4 }
  0x55   : > { %s2181_s4 = smov [#allocation4]  }
  0x56   : > { %p2045_p7 = pneg %p2044_p3  ;;  %s2046_s8 = sshll.u32 %s2181_s4, 4  ;;  %s2047_s8 = int_to_ptr.vmem [resolvable:$false] %s2046_s8 }
  0x57   : > { %s2048_s28 = scalar_lea.vmem %s2047_s8, 128  ;;  %p2049_p12 = scmp.lt.s32.totalorder %s597_s23, %s2047_s8 }
  0x58   : > { %p2050_p10 = scmp.lt.s32.totalorder %s2048_s28, %s2041_s29 }
  0x5a   : > { %p2051_p13 = por %p2050_p10, %p2049_p12 }
  0x5c   : > { %p2052_p0 = pnand %p2051_p13, %p2045_p7 }
  0x5e   : > { %2055 = shalt.err (!%p2052_p0)
}
  0x5f   : > { %1849 = dma.hbm_to_vmem [thread:$0]  (!%p2416_p9), %s594_s6, 64, %s597_s23, %s586_s0  }
  0x60   : > { %s1664_s19 = sshll.u32 %s2172_s1, 4  ;;  %s606_s18 = scalar_lea.vmem [#allocation7], %s2402_s26 }
  0x61   : > { %s613_s27 = sshll.u32 %s606_s18, 4  ;;  %s2717_s22 = sld [smem:[#allocation28_spill]]  ;;  %s614_s27 = int_to_ptr.vmem [resolvable:$true] %s613_s27 }
  0x62   : > { %s604_s16 = scalar_lea.sflag [#allocation8], %s603_s25  ;;  %s2069_s8 = scalar_lea.vmem %s614_s27, 16 }
  0x63   : > { %p2070_p1 = scmp.ne.s32.totalorder %s614_s27, %s2069_s8  ;;  %s2182_s29 = smov [#allocation7]  }
  0x64   : > { %s2074_s28 = sshll.u32 %s2182_s29, 4  ;;  %s2075_s28 = int_to_ptr.vmem [resolvable:$false] %s2074_s28 }
  0x65   : > { %p2072_p2 = pnand %p2070_p1, %p2030_p4  ;;  %s2076_s14 = scalar_lea.vmem %s2075_s28, 32 }
  0x66   : > { %p2077_p6 = scmp.lt.s32.totalorder %s614_s27, %s2075_s28  ;;  %p2078_p3 = scmp.lt.s32.totalorder %s2076_s14, %s2069_s8 }
  0x67   : > { %s611_s4 = scalar_lea.hbm %s2717_s22, %s1664_s19  ;;  %p2073_p11 = pneg %p2072_p2 }
  0x68   : > { %p2079_p7 = por %p2078_p3, %p2077_p6 }
  0x6a   : > { %p2080_p12 = pnand %p2079_p7, %p2073_p11 }
  0x6c   : > { %2083 = shalt.err (!%p2080_p12)
}
  0x6d   : > { %1852 = dma.hbm_to_vmem [thread:$0]  (!%p2416_p9), %s611_s4, 16, %s614_s27, %s604_s16  }
  0x6e   : > { %632 = sbr.rel (%p2340_p8) target bundleno = 2511 (0x9cf), region = 96  ;;  %s2442_s6 = sand.u32 (!%p2340_p8), 1, %s2160_s30  }
  0x6f   : > { %s1666_s20 = sshll.u32 (!%p2340_p8), %s2442_s6, 2  ;;  %s635_s22 = scalar_lea.sflag (!%p2340_p8), [#allocation5], %s2442_s6 }
  0x70   : > { %s2448_s14 = scalar_lea.vmem (!%p2340_p8), [#allocation4], %s1666_s20  ;;  %p2718_p4 = scmp.ne.s32.totalorder (!%p2340_p8), %s2702_s24, 0 }
  0x73   : > { %2135 = dma.done.wait (%p2718_p4), %s635_s22, 64  }
  0x74   : > { %2137 = vsyncadd (%p2718_p4), %s635_s22, 4294967232  ;;  %s643_s16 = sand.u32 1, %s2321_s2   ;;  %s646_s3 = scalar_lea.vmem [#allocation7], %s2442_s6 }
  0x75   : > { %s644_s21 = scalar_lea.sflag [#allocation8], %s643_s16 }
  0x76   : > { %2139 = dma.done.wait (%p2718_p4), %s644_s21, 16  }
  0x77   : > { %2141 = vsyncadd (%p2718_p4), %s644_s21, 4294967280  ;;  %p2719_p8 = scmp.eq.s32.totalorder %s2321_s2, 0 }
  0x79   : > { %2143 = dma.done.wait (%p2719_p8), [#allocation8], 16   ;;  %p2720_p9 = pmov %p2719_p8 }
  0x7a   : > { %p2721_p10 = pmov %p2719_p8 }
  0x7b   : > { %2145 = vsyncadd (%p2720_p9), [#allocation8], 4294967280 }
  0x7c   : > { %2147 = dma.done.wait (%p2721_p10), [#allocation11], 32   ;;  %p2722_p13 = pmov %p2719_p8 }
  0x7d   : > { %v2183_v0 = vmov 0.0   ;;  %vm2184_vm0 = vmmov 0   ;;  %v1924_v1 = vld [vmem:[%s2658_s5 + $0x8] sm:$0xff]   ;;  %v1925_v2 = vld [vmem:[%s2658_s5] sm:$0xff]   ;;  %v736_v3 = vld [vmem:[%s2448_s14] sm:$0xf]  ;;  %v971_v39 = vlaneseq }
  0x7e   : > { %2149 = vsyncadd (%p2722_p13), [#allocation11], 4294967264  ;;  %1742 = vmatprep.subr.bf16.mxu0 %v2183_v0  ;;  %1746 = vmatprep.mubr.msk.bf16.mxu0 %vm2184_vm0, %v2183_v0  ;;  %vm760_vm1 = vcmask 261120   ;;  %s2723_s0 = sld [smem:[#allocation30_spill]]  ;;  %v2494_v6 = vld [vmem:[%s2448_s14] sm:$0xf] }
  0x7f   : > { %1750 = vmatprep.subr.bf16.mxu1 %v2183_v0  ;;  %1754 = vmatprep.mubr.msk.bf16.mxu1 %vm2184_vm0, %v2183_v0  ;;  %v1928_v7 = vld [vmem:[%s2660_s7 + $0x8] sm:$0xff]   ;;  %v1929_v8 = vld [vmem:[%s2660_s7] sm:$0xff]   ;;  %v1672_v9 = vld [vmem:[#allocation10] ss:$0 sm:$0xff]  ;;  %vm868_vm2 = vcmask 125952   ;;  %s2185_s22 = smov 112  }
  0x80   : > { %1743 = vmatpush3.bf16.msra.mxu0 %v1924_v1  ;;  %1751 = vmatpush3.bf16.msra.mxu1 %v1928_v7  ;;  %v1682_v16 = vld [vmem:[#allocation9] ss:$0 sm:$0xff]  ;;  %v2186_v19 = vmov 0   ;;  %vm987_vm3 = vcmask 130048   ;;  %v1676_v27 = vld [vmem:[#allocation12] ss:$0 sm:$0xff] }
  0x81   : > { %1744 = vmatprep.subr.bf16.mxu0 %v2183_v0  ;;  %1752 = vmatprep.subr.bf16.mxu1 %v2183_v0  ;;  %v894_v40 = vld [vmem:[%s646_s3] sm:$0x1]  ;;  %v972_v41 = vshrl.u32 %v971_v39, 7  ;;  %v976_v44 = vand.u32 127, %v971_v39  ;;  %v2187_v46 = vmov -1e+09  }
  0x82   : > { %1922 = vset.pattern.permute.xlu1 %v2186_v19  ;;  %1923 = vset.pattern.permute.xlu0 %v2186_v19  ;;  %vm978_vm4 = vcmp.gt.f32.partialorder %v894_v40, 0.5  ;;  %vm1110_vm8 = vcmask 1043456   ;;  %vm1080_vm9 = vcmask 64512   ;;  %s2188_s24 = smov 16   ;;  %s2725_s23 = sld [smem:[#allocation34_spill]]  ;;  %vm1412_vm10 = vcmask 523264  }
  0x83   : > { %v982_v42 = vsub.s32 0, %v972_v41  ;;  %v979_v43 = vsel %vm978_vm4, 1, %v2186_v19  ;;  %vm977_vm5 = vcmp.le.s32.totalorder %v976_v44, %v972_v41  ;;  %s2727_s18 = sld [smem:[#allocation21_spill]]  ;;  %s723_s26 = scalar_lea.vmem [#allocation13], %s1666_s20  ;;  %vm1494_vm11 = vcmask 257024  }
  0x84   : > { %s2724_s19 = smov %s2723_s0  ;;  %v1926_v4 = vld [vmem:[%s2723_s0 + $0x8] sm:$0xff]   ;;  %1745 = vmatpush3.bf16.msra.mxu0 %v1925_v2  ;;  %1753 = vmatpush3.bf16.msra.mxu1 %v1929_v8  ;;  %s2726_s0 = sld [smem:[#allocation35_spill]] }
  0x85   : > { %1758 = vmatprep.subr.bf16.mxu0 %v2183_v0  ;;  %v1927_v5 = vld [vmem:[%s2724_s19] sm:$0xff]   ;;  %1766 = vmatprep.subr.bf16.mxu1 %v2183_v0  ;;  %v983_v45 = vrot.slane %v979_v43, %v982_v42  ;;  %s2728_s28 = sld [smem:[#allocation29_spill]]  ;;  %s1511_s17 = sshll.u32 %s723_s26, 4  ;;  %s1512_s17 = int_to_ptr.vmem [resolvable:$true] %s1511_s17 }
  0x86   : > { %s2729_s21 = sld [smem:[#allocation36_spill]]  ;;  %s1497_s29 = scalar_lea.sflag [#allocation6], %s2442_s6 }
  0x87   : > { %1747 = vmatmul.mubr.msk.bf16.vlgmr.msra.gmra.mxu0 %vm760_vm1, %v736_v3  ;;  %1755 = vmatmul.mubr.msk.bf16.vlgmr.msra.gmra.mxu1 %vm760_vm1, %v736_v3  ;;  %vm984_vm6 = vcmp.eq.s32.totalorder %v983_v45, 1  ;;  %s2730_s25 = sld [smem:[#allocation37_spill]] }
  0x88   : > { %1759 = vmatpush3.bf16.msra.mxu0 %v1926_v4  ;;  %1762 = vmatprep.mubr.msk.bf16.mxu0 %vm2184_vm0, %v2183_v0  ;;  %vm985_vm7 = vmand %vm977_vm5, %vm984_vm6 }
  0x89   : > { %1760 = vmatprep.subr.bf16.mxu0 %v2183_v0  ;;  %1768 = vmatprep.mubr.msk.bf16.mxu1 %vm2184_vm0, %v2183_v0  ;;  %v986_v47 = vsel %vm985_vm7, 0.0, %v2187_v46  ;;  %p724_p0 = scmp.lt.s32.totalorder %s2727_s18, 1 }
  0x8b   : > { %s725_s27 = scalar_select %p724_p0, %s2727_s18, 1 }
  0x8c   : > { %1761 = vmatpush3.bf16.msra.mxu0 %v1927_v5 }
  0x8d   : > { %1772 = vmatprep.subr.bf16.mxu0 %v2183_v0  ;;  %s1671_s4 = sshll.u32 %s725_s27, 3 }
  0x8f   : > { %1763 = vmatmul.mubr.msk.bf16.vlgmr.msra.gmra.mxu0 %vm760_vm1, %v2494_v6 }
  0x90   : > { %1774 = vmatprep.mubr.msk.bf16.mxu0 %vm2184_vm0, %v2183_v0 }
 0x147   : > { %v798_v10 = vpop.f32.mrf.mxu0  ;;  %v861_v28 = vpop.f32.mrf.mxu1 }
 0x148   : > { %v799_v11 = vadd.f32 %v1672_v9, %v798_v10  ;;  %v862_v29 = vadd.f32 %v1676_v27, %v861_v28 }
 0x149   : > { %v1748_v12 = vpop.f32.mrf.mxu0  ;;  %v1756_v30 = vpop.f32.mrf.mxu1 }
 0x14a   : > { %v867_v13 = vpack.c.bf16 %v799_v11, %v799_v11  ;;  %v870_v31 = vpack.c.bf16 %v862_v29, %v862_v29 }
 0x14b   : > { %v801_v14 = vpop.f32.mrf.mxu0  ;;  %v864_v32 = vpop.f32.mrf.mxu1 }
 0x14c   : > { %869 = vst.msk [vmem:[#allocation2] sm:$0xf] %vm868_vm2, %v867_v13  ;;  %875 = vrot.lane.b32.xlu0 %v867_v13, %s2185_s22  ;;  %871 = vst.msk [vmem:[#allocation3] sm:$0xf] %vm868_vm2, %v870_v31 }
 0x14d   : > { %v1749_v15 = vpop.f32.mrf.mxu0  ;;  %v1757_v33 = vpop.f32.mrf.mxu1 }
 0x14f   : > { %v956_v17 = vpop.f32.mrf.mxu0 }
 0x150   : > { %v957_v18 = vadd.f32 %v1682_v16, %v956_v17 }
 0x151   : > { %v1764_v20 = vpop.f32.mrf.mxu0 }
 0x152   : > { %v962_v21 = vmul.f32 0.25, %v957_v18 }
 0x153   : > { %v959_v22 = vpop.f32.mrf.mxu0  ;;  %v969_v23 = vld [vmem:[#allocation2] sm:$0xf]  ;;  %v1105_v53 = vld [vmem:[#allocation3] sm:$0xf] }
 0x154   : > { %v992_v24 = vsel %vm987_vm3, %v969_v23, 0  ;;  %964 = vrot.lane.b32.xlu0 %v962_v21, %s2185_s22  ;;  %v967_v26 = vpack.c.bf16 %v962_v21, %v962_v21  ;;  %v1112_v54 = vsel %vm1110_vm8, %v1105_v53, 0  ;;  %v1930_v21 = vld [vmem:[%s2662_s9 + $0x8] sm:$0xff]   ;;  %v1931_v22 = vld [vmem:[%s2662_s9] sm:$0xff]  }
 0x155   : > { %1767 = vmatpush3.bf16.xpose.msra.mxu1 %v992_v24  ;;  %v1765_v25 = vpop.f32.mrf.mxu0 }
 0x156   : > { %1778 = vmatprep.subr.bf16.mxu1 %v2183_v0 }
 0x15c   : > { %1769 = vmatmul.mubr.msk.bf16.vlgmr.msra.gmra.mxu1 %vm987_vm3, %v967_v26 }
 0x15d   : > { %1780 = vmatprep.mubr.msk.bf16.mxu1 %vm2184_vm0, %v2183_v0  ;;  %1779 = vmatpush3.bf16.msra.mxu1 %v1112_v54 }
 0x15e   : > { %1790 = vmatprep.subr.bf16.mxu1 %v2183_v0 }
 0x1be   : > { %v876_v34 = vpop.permute.xlu0 %875 }
 0x1bf   : > { %879 = vst.msk [vmem:[#allocation2 + $0x4] sm:$0xf] %vm868_vm2, %v876_v34  ;;  %v1690_v34 = vld [vmem:[%s2663_s10] ss:$0 sm:$0xff] }
 0x1c6   : > { %v970_v35 = vld [vmem:[#allocation2 + $0x4] sm:$0xf]  ;;  %v965_v37 = vpop.permute.xlu0 %964 }
 0x1c7   : > { %v1038_v36 = vsel %vm987_vm3, %v970_v35, 0  ;;  %v968_v38 = vpack.c.bf16 %v965_v37, %v965_v37  ;;  %v1272_v35 = vunpack.c.l.bf16 %v2494_v6  ;;  %v1932_v6 = vld [vmem:[%s2666_s13 + $0x8] sm:$0xff]  }
 0x1c8   : > { %1773 = vmatpush3.bf16.xpose.msra.mxu0 %v1038_v36 }
 0x1c9   : > { %1784 = vmatprep.subr.bf16.mxu0 %v2183_v0 }
 0x1cf   : > { %1775 = vmatmul.mubr.msk.bf16.vlgmr.msra.gmra.mxu0 %vm987_vm3, %v968_v38 }
 0x1d0   : > { %1786 = vmatprep.mubr.msk.bf16.mxu0 %vm2184_vm0, %v2183_v0 }
 0x21c   : > { %v1028_v48 = vpop.f32.mrf.mxu1 }
 0x21d   : > { %v1029_v49 = vadd.f32 %v1028_v48, %v986_v47  ;;  %v1933_v48 = vld [vmem:[%s2666_s13] sm:$0xff]  }
 0x21e   : > { %v1770_v50 = vpop.f32.mrf.mxu1 }
 0x21f   : > { %v1081_v61 = vsel %vm1080_vm9, %v1029_v49, -inf  ;;  %v1935_v50 = vld [vmem:[%s2668_s15 + $0x10] sm:$0xff]  }
 0x220   : > { %v1031_v51 = vpop.f32.mrf.mxu1 }
 0x222   : > { %v1771_v52 = vpop.f32.mrf.mxu1 }
 0x28f   : > { %v1074_v55 = vpop.f32.mrf.mxu0 }
 0x290   : > { %v1075_v56 = vadd.f32 %v1074_v55, %v986_v47  ;;  %v1694_v55 = vld [vmem:[%s2664_s11] ss:$0 sm:$0xff] }
 0x291   : > { %v1776_v57 = vpop.f32.mrf.mxu0 }
 0x292   : > { %v1084_v58 = vsel %vm1080_vm9, %v1075_v56, -inf  ;;  %v1695_v57 = vld [vmem:[%s2665_s12] ss:$0 sm:$0xff] }
 0x293   : > { %1085 = vmax.xlane.f32.xlu1 %v1084_v58  ;;  %v1077_v59 = vpop.f32.mrf.mxu0 }
 0x295   : > { %v1777_v60 = vpop.f32.mrf.mxu0 }
 0x297   : > { %1082 = vmax.xlane.f32.xlu1 %v1081_v61  ;;  %v1936_v61 = vld [vmem:[%s2668_s15 + $0x8] sm:$0xff]  }
 0x2a8   : > { %883 = vrot.lane.b32.xlu1 %v870_v31, %s2185_s22  ;;  %s730_s22 = scalar_lea.vmem %s2728_s28, %s1671_s4  ;;  %s2732_s4 = sld [smem:[#allocation38_spill]] }
 0x2a9   : > { %s2084_s28 = scalar_lea.vmem %s1512_s17, 64 }
 0x2aa   : > { %p2085_p1 = scmp.ne.s32.totalorder %s1512_s17, %s2084_s28 }
 0x2ac   : > { %p2086_p2 = pnand %p2085_p1, %p2394_p5 }
 0x2ae   : > { %p2087_p11 = pneg %p2086_p2 }
 0x31c   : > { %v1086_v62 = vpop.xlane.xlu1 %1085 }
 0x31d   : > { %v1088_v63 = vsub.f32 %v1075_v56, %v1086_v62  ;;  %v1937_v62 = vld [vmem:[%s2668_s15] sm:$0xff]  }
 0x31f   : > { %v1091_v1 = vmul.f32 1.442695, %v1088_v63  ;;  %v1696_v63 = vld [vmem:[%s2725_s23] ss:$0 sm:$0xff]  ;;  %s1709_s23 = sshll.u32 %s2727_s18, 6 }
 0x320   : > { %v1083_v2 = vpop.xlane.xlu1 %1082  ;;  %s1509_s8 = scalar_lea.hbm %s2732_s4, %s1709_s23 }
 0x321   : > { %1938 = vpow2.f32 %v1091_v1  ;;  %v1087_v3 = vsub.f32 %v1029_v49, %v1083_v2  ;;  %v1934_v49 = vld [vmem:[%s2668_s15 + $0x18] sm:$0xff]  }
 0x323   : > { %v1089_v4 = vmul.f32 1.442695, %v1087_v3 }
 0x324   : > { %v884_v5 = vpop.permute.xlu1 %883 }
 0x325   : > { %1940 = vpow2.f32 %v1089_v4  ;;  %887 = vst.msk [vmem:[#allocation3 + $0x4] sm:$0xf] %vm868_vm2, %v884_v5 }
 0x32c   : > { %v1106_v7 = vld [vmem:[#allocation3 + $0x4] sm:$0xf] }
 0x32d   : > { %v1158_v8 = vsel %vm1110_vm8, %v1106_v7, 0 }
 0x32e   : > { %v1939_v9 = vpop.eup %1938  ;;  %1785 = vmatpush3.bf16.msra.mxu0 %v1158_v8 }
 0x32f   : > { %v1096_v10 = vsel %vm1080_vm9, %v1939_v9, 0.0  ;;  %1798 = vmatprep.subr.bf16.mxu0 %v2183_v0 }
 0x330   : > { %1097 = vadd.xlane.f32.xlu0 %v1096_v10 }
 0x332   : > { %v1941_v11 = vpop.eup %1940 }
 0x333   : > { %v1093_v12 = vsel %vm1080_vm9, %v1941_v11, 0.0 }
 0x334   : > { %1094 = vadd.xlane.f32.xlu1 %v1093_v12 }
 0x3b9   : > { %v1098_v13 = vpop.xlane.xlu0 %1097 }
 0x3ba   : > { %1942 = vrcp.f32 %v1098_v13 }
 0x3bd   : > { %v1095_v14 = vpop.xlane.xlu1 %1094 }
 0x3be   : > { %1944 = vrcp.f32 %v1095_v14 }
 0x3c7   : > { %v1943_v15 = vpop.eup %1942 }
 0x3c8   : > { %v1102_v16 = vmul.f32 %v1943_v15, %v1939_v9 }
 0x3ca   : > { %v1104_v17 = vpack.c.bf16 %v1102_v16, %v1102_v16 }
 0x3cb   : > { %v1945_v18 = vpop.eup %1944 }
 0x3cc   : > { %1787 = vmatmul.mubr.msk.bf16.vlgmr.msra.gmra.mxu0 %vm1080_vm9, %v1104_v17  ;;  %v1101_v19 = vmul.f32 %v1945_v18, %v1941_v11 }
 0x3cd   : > { %1802 = vmatprep.mubr.msk.bf16.mxu0 %vm2184_vm0, %v2183_v0  ;;  %1799 = vmatpush3.bf16.msra.mxu0 %v1932_v6 }
 0x3ce   : > { %v1103_v20 = vpack.c.bf16 %v1101_v19, %v1101_v19  ;;  %1800 = vmatprep.subr.bf16.mxu0 %v2183_v0 }
 0x3d0   : > { %1781 = vmatmul.mubr.msk.bf16.vlgmr.msra.gmra.mxu1 %vm1080_vm9, %v1103_v20 }
 0x3d1   : > { %1794 = vmatprep.mubr.msk.bf16.mxu1 %vm2184_vm0, %v2183_v0  ;;  %1791 = vmatpush3.bf16.msra.mxu1 %v1930_v21  ;;  %v1486_v21 = vld [vmem:[%s730_s22] sm:$0xff]  ;;  %s2189_s22 = smov [#allocation13]  }
 0x3d2   : > { %1792 = vmatprep.subr.bf16.mxu1 %v2183_v0  ;;  %1801 = vmatpush3.bf16.msra.mxu0 %v1933_v48  ;;  %s2088_s18 = sshll.u32 %s2189_s22, 4  ;;  %s2089_s18 = int_to_ptr.vmem [resolvable:$false] %s2088_s18 }
 0x3d3   : > { %s2090_s20 = scalar_lea.vmem %s2089_s18, 128  ;;  %p2091_p6 = scmp.lt.s32.totalorder %s1512_s17, %s2089_s18 }
 0x3d4   : > { %p2092_p3 = scmp.lt.s32.totalorder %s2090_s20, %s2084_s28 }
 0x3d5   : > { %1793 = vmatpush3.bf16.msra.mxu1 %v1931_v22 }
 0x3d6   : > { %1806 = vmatprep.subr.bf16.mxu1 %v2183_v0  ;;  %p2093_p7 = por %p2092_p3, %p2091_p6 }
 0x3d8   : > { %p2094_p12 = pnand %p2093_p7, %p2087_p11 }
 0x48c   : > { %v1194_v23 = vpop.f32.mrf.mxu0 }
 0x48d   : > { %1201 = vrot.lane.b32.xlu0 %v1194_v23, %s2188_s24 }
 0x48e   : > { %v1788_v24 = vpop.f32.mrf.mxu0 }
 0x490   : > { %v1148_v25 = vpop.f32.mrf.mxu1  ;;  %v1197_v26 = vpop.f32.mrf.mxu0 }
 0x491   : > { %v1706_v26 = vld [vmem:[%s2729_s21] ss:$0 sm:$0xff] }
 0x492   : > { %v1782_v27 = vpop.f32.mrf.mxu1  ;;  %v1789_v28 = vpop.f32.mrf.mxu0 }
 0x493   : > { %v1707_v28 = vld [vmem:[%s2730_s25] ss:$0 sm:$0xff] }
 0x494   : > { %v1151_v29 = vpop.f32.mrf.mxu1 }
 0x496   : > { %v1783_v30 = vpop.f32.mrf.mxu1 }
 0x4ff   : > { %v1202_v31 = vpop.permute.xlu0 %1201 }
 0x500   : > { %v1204_v32 = vsel %vm987_vm3, %v1148_v25, %v1202_v31 }
 0x501   : > { %v1205_v33 = vpack.c.bf16 %v1204_v32, %v1204_v32 }
 0x503   : > { %1795 = vmatmul.mubr.msk.bf16.vlgmr.msra.gmra.mxu1 %vm760_vm1, %v1205_v33 }
 0x504   : > { %1814 = vmatprep.mubr.msk.bf16.mxu1 %vm2184_vm0, %v2183_v0  ;;  %1807 = vmatpush3.bf16.msra.mxu1 %v1934_v49 }
 0x505   : > { %1808 = vmatprep.subr.bf16.mxu1 %v2183_v0 }
 0x508   : > { %1809 = vmatpush3.bf16.msra.mxu1 %v1935_v50 }
 0x509   : > { %1810 = vmatprep.subr.bf16.mxu1 %v2183_v0 }
 0x50c   : > { %1811 = vmatpush3.bf16.msra.mxu1 %v1936_v61 }
 0x50d   : > { %1812 = vmatprep.subr.bf16.mxu1 %v2183_v0  ;;  %v1700_v0 = vld [vmem:[%s2726_s0] ss:$0 sm:$0xff] }
 0x510   : > { %1813 = vmatpush3.bf16.msra.mxu1 %v1937_v62 }
 0x5c3   : > { %v1266_v36 = vpop.f32.mrf.mxu1 }
 0x5c4   : > { %v1267_v37 = vadd.f32 %v1690_v34, %v1266_v36 }
 0x5c5   : > { %v1796_v38 = vpop.f32.mrf.mxu1 }
 0x5c6   : > { %v1273_v39 = vadd.f32 %v1272_v35, %v1267_v37 }
 0x5c7   : > { %v1269_v40 = vpop.f32.mrf.mxu1 }
 0x5c8   : > { %v1276_v41 = vsel %vm760_vm1, %v1273_v39, 0.0 }
 0x5c9   : > { %1277 = vadd.xlane.f32.xlu0 %v1276_v41  ;;  %v1797_v42 = vpop.f32.mrf.mxu1 }
 0x652   : > { %v1278_v43 = vpop.xlane.xlu0 %1277 }
 0x653   : > { %v1280_v44 = vmul.f32 0.03125, %v1278_v43 }
 0x655   : > { %v1281_v45 = vsub.f32 %v1273_v39, %v1280_v44 }
 0x657   : > { %v1282_v46 = vmul.f32 %v1281_v45, %v1281_v45 }
 0x659   : > { %v1283_v47 = vsel %vm760_vm1, %v1282_v46, 0.0 }
 0x65a   : > { %1284 = vadd.xlane.f32.xlu1 %v1283_v47 }
 0x6e3   : > { %v1285_v51 = vpop.xlane.xlu1 %1284 }
 0x6e4   : > { %v1286_v52 = vmul.f32 0.03125, %v1285_v51 }
 0x6e6   : > { %v1287_v53 = vadd.f32 1e-05, %v1286_v52 }
 0x6e8   : > { %1946 = vrsqrt.f32 %v1287_v53 }
 0x6f5   : > { %v1947_v54 = vpop.eup %1946 }
 0x6f6   : > { %v1289_v56 = vmul.f32 %v1947_v54, %v1281_v45 }
 0x6f8   : > { %v1296_v58 = vmul.f32 %v1694_v55, %v1289_v56 }
 0x6fa   : > { %v1303_v59 = vadd.f32 %v1695_v57, %v1296_v58 }
 0x6fc   : > { %v1304_v60 = vpack.c.bf16 %v1303_v59, %v1303_v59 }
 0x6fe   : > { %1803 = vmatmul.mubr.msk.bf16.vlgmr.msra.gmra.mxu0 %vm760_vm1, %v1304_v60 }
 0x7be   : > { %v1365_v1 = vpop.f32.mrf.mxu0 }
 0x7bf   : > { %v1366_v2 = vadd.f32 %v1696_v63, %v1365_v1 }
 0x7c0   : > { %v1804_v3 = vpop.f32.mrf.mxu0 }
 0x7c1   : > { %v1371_v4 = vmax.f32 %v1366_v2, 0.0 }
 0x7c2   : > { %v1368_v5 = vpop.f32.mrf.mxu0 }
 0x7c3   : > { %v1372_v7 = vpack.c.bf16 %v1371_v4, %v1371_v4 }
 0x7c4   : > { %v1805_v8 = vpop.f32.mrf.mxu0 }
 0x7c5   : > { %1815 = vmatmul.mubr.msk.bf16.vlgmr.msra.gmra.mxu1 %vm1412_vm10, %v1372_v7 }
 0x885   : > { %v1450_v9 = vpop.f32.mrf.mxu1 }
 0x886   : > { %v1451_v10 = vadd.f32 %v1700_v0, %v1450_v9 }
 0x887   : > { %v1816_v11 = vpop.f32.mrf.mxu1 }
 0x888   : > { %v1456_v12 = vadd.f32 %v1451_v10, %v1303_v59 }
 0x889   : > { %v1453_v13 = vpop.f32.mrf.mxu1 }
 0x88a   : > { %v1459_v14 = vsel %vm760_vm1, %v1456_v12, 0.0 }
 0x88b   : > { %1460 = vadd.xlane.f32.xlu1 %v1459_v14  ;;  %v1817_v15 = vpop.f32.mrf.mxu1 }
 0x914   : > { %v1461_v16 = vpop.xlane.xlu1 %1460 }
 0x915   : > { %v1462_v17 = vmul.f32 0.03125, %v1461_v16 }
 0x917   : > { %v1463_v18 = vsub.f32 %v1456_v12, %v1462_v17 }
 0x919   : > { %v1464_v19 = vmul.f32 %v1463_v18, %v1463_v18 }
 0x91b   : > { %v1465_v20 = vsel %vm760_vm1, %v1464_v19, 0.0 }
 0x91c   : > { %1466 = vadd.xlane.f32.xlu1 %v1465_v20 }
 0x92d   : > { %1489 = vperm.xlu1 %1922, %v1486_v21  }
 0x9a5   : > { %v1467_v22 = vpop.xlane.xlu1 %1466 }
 0x9a6   : > { %v1468_v23 = vmul.f32 0.03125, %v1467_v22 }
 0x9a8   : > { %v1469_v24 = vadd.f32 1e-05, %v1468_v23 }
 0x9a9   : > { %v1490_v30 = vpop.permute.xlu1 %1489 }
 0x9aa   : > { %1948 = vrsqrt.f32 %v1469_v24 }
 0x9b7   : > { %v1949_v25 = vpop.eup %1948 }
 0x9b8   : > { %v1471_v27 = vmul.f32 %v1949_v25, %v1463_v18 }
 0x9ba   : > { %v1478_v29 = vmul.f32 %v1706_v26, %v1471_v27 }
 0x9bc   : > { %v1485_v31 = vadd.f32 %v1707_v28, %v1478_v29 }
 0x9be   : > { %v1492_v32 = vmul.f32 %v1490_v30, %v1485_v31 }
 0x9c0   : > { %v1493_v33 = vpack.c.bf16 %v1492_v32, %v1492_v32 }
 0x9c2   : > { %1495 = vst.msk [vmem:[%s723_s26] sm:$0xf] %vm1494_vm11, %v1493_v33 }
 0x9c3   : > { %2097 = shalt.err (!%p2094_p12)
}
 0x9c4   : > { %s2098_s14 = scalar_lea.hbm %s1509_s8, 64  ;;  %s2102_s21 = scalar_lea.hbm %s2732_s4, 128 }
 0x9c5   : > { %p2099_p4 = scmp.ne.s32.totalorder %s1509_s8, %s2098_s14  ;;  %p2103_p10 = scmp.lt.s32.totalorder %s1509_s8, %s2732_s4 }
 0x9c6   : > { %p2104_p13 = scmp.lt.s32.totalorder %s2102_s21, %s2098_s14 }
 0x9c7   : > { %p2100_p8 = pnand %p2099_p4, %p2394_p5 }
 0x9c8   : > { %p2105_p0 = por %p2104_p13, %p2103_p10 }
 0x9c9   : > { %p2101_p9 = pneg %p2100_p8 }
 0x9cb   : > { %p2106_p1 = pnand %p2105_p0, %p2101_p9 }
 0x9cd   : > { %2109 = shalt.err (!%p2106_p1)
}
 0x9ce   : > { %1834 = dma.vmem_to_hbm [thread:$0]  (%p2394_p5), %s1512_s17, 64, %s1509_s8, %s1497_s29  }
 0x9cf PF: > { %s2733_s25 = sld [smem:[#allocation19_spill]] }
 0x9d0   : > { %s2734_s23 = sld [smem:[#allocation23_spill]] }
 0x9d1   : > { %s2735_s26 = sld [smem:[#allocation22_spill]] }
 0x9d5   : > { %s1523_s0 = sand.u32 1, %s2733_s25  }
 0x9d6   : > { %p2736_p2 = scmp.ne.s32.totalorder %s2734_s23, 0  ;;  %s1524_s27 = scalar_lea.sflag [#allocation6], %s1523_s0 }
 0x9d7   : > { %p2737_p11 = scmp.ge.s32.totalorder %s2735_s26, 2 }
 0x9d9   : > { %p1854_p6 = pnand %p2737_p11, %p2736_p2 }
 0x9db   : > { %p1855_p3 = pneg %p1854_p6 }
 0x9dd   : > { %2151 = dma.done.wait (%p1855_p3), %s1524_s27, 64  }
 0x9de   : > { %2153 = vsyncadd (%p1855_p3), %s1524_s27, 4294967232  ;;  %s39_s22 = sadd.s32 1, %s2735_s26   ;;  %s2738_s28 = sld [smem:[#allocation20_spill]] }
 0x9df   : > { %p36_p7 = scmp.ge.s32.totalorder %s39_s22, 4   ;;  %s2739_s20 = sld [smem:[#allocation26_spill]] }
 0x9e0   : > { %s2740_s2 = sld [smem:[#allocation25_spill]]  ;;  %s2741_s0 = smov %s2160_s30 }
 0x9e1   : > { %s2743_s21 = smov %s2172_s1 }
 0x9e2   :  { %38 = sbr.rel (!%p36_p7) target bundleno = 22 (0x16), region = 176 }
 0x9e4   : > { %s2742_s30 = smov %s2738_s28 }
 0x9e6   : > { %s2744_s1 = smov %s2740_s2 }
 0x9e7   :  { %1529 = vsyncpa [#allocation5], 1 }
 0x9e8   :  { %1531 = vsyncpa [#allocation5 + $0x1], 1 }
 0x9e9   :  { %1532 = vsyncpa [#allocation8], 1 }
 0x9ea   :  { %1534 = vsyncpa [#allocation8 + $0x1], 1 }
 0x9eb   :  { %1535 = vsyncpa [#allocation11], 1 }
 0x9ec   :  { %1536 = vsyncpa [#allocation6], 1 }
 0x9ed   :  { %1538 = vsyncpa [#allocation6 + $0x1], 1 }

</bundles_post_ra>
